<compile_context>
chip_gen: v7x
topology: tpu7x:2x2x1
jax: 0.10.0
libtpu: 0.0.40
codegen_flags: <defaults>
</compile_context>

<pallas_src>
import functools

import jax
import jax.numpy as jnp
from jax.experimental import pallas as pl
from jax.experimental.pallas import tpu as pltpu


Z_DIM = 32
IN_DIM = 3 * 28 * 28          # 2352
K_PAD = 2432                  # 2352 padded up to a multiple of 128
HIDDEN = 64
FUSED = 2 * HIDDEN            # 128: source+target hidden lanes, fused
OUT_PAD = 128                 # lane-dense output width (z=32 padded to 128)
SRC_DEPTH = 4                 # MLP(2352, 64, depth=4)
TGT_DEPTH = 4                 # MLP(2352, 64, depth=4)
COMBINE_DEPTH = 2             # MLP(128, z) with default depth=2
N_HIDDEN = SRC_DEPTH - 1      # branch layers after the first one


def _round_up(x, m):
    return ((x + m - 1) // m) * m


# ----------------------------------------------------------------------------
# Kernel
# ----------------------------------------------------------------------------
def encoder_kernel(src_ref, tgt_ref, w1_ref, b1_ref, wh_ref, bh_ref,
                   wc_ref, bc_ref, out_ref):
    """One batch tile of the fused Encoder forward.

    src_ref/tgt_ref: (TB, K_PAD) bf16 input tiles.
    w1_ref: (2, K_PAD, 64) bf16   first-layer weights [source, target].
    b1_ref: (1, 128) f32          first-layer biases  [source | target].
    wh_ref: (3, 128, 128) bf16    block-diag hidden weights of both branches.
    bh_ref: (3, 1, 128) f32       packed hidden biases.
    wc_ref: (2, 128, 128) bf16    combine weights, zero-padded to 128 lanes.
    bc_ref: (2, 1, 128) f32       combine biases, zero-padded.
    out_ref: (TB, 128) f32        lane-dense padded output (z in lanes 0:32).
    """
    # Layer 0 of both branch MLPs (dominant K=2432 matmuls, f32 accumulation).
    sc = jnp.dot(src_ref[...], w1_ref[0], preferred_element_type=jnp.float32)
    tg = jnp.dot(tgt_ref[...], w1_ref[1], preferred_element_type=jnp.float32)
    x = jnp.concatenate([sc, tg], axis=1) + b1_ref[...]       # (TB, 128) f32
    x = jnp.maximum(x, 0.0)

    # Hidden layers 1..3 of both branches fused as block-diagonal 128x128.
    for i in range(N_HIDDEN):
        x = jnp.dot(x.astype(jnp.bfloat16), wh_ref[i],
                    preferred_element_type=jnp.float32) + bh_ref[i]
        if i < N_HIDDEN - 1:        # no ReLU after each branch's last layer
            x = jnp.maximum(x, 0.0)

    # Combine MLP (depth=2), output padded to 128 lanes (lanes 32:128 are 0).
    x = jnp.dot(x.astype(jnp.bfloat16), wc_ref[0],
                preferred_element_type=jnp.float32) + bc_ref[0]
    x = jnp.maximum(x, 0.0)
    x = jnp.dot(x.astype(jnp.bfloat16), wc_ref[1],
                preferred_element_type=jnp.float32) + bc_ref[1]
    out_ref[...] = x.astype(out_ref.dtype)


# ----------------------------------------------------------------------------
# Parameter init (mimics torch.nn.Linear default init)
# ----------------------------------------------------------------------------
def _init_linear(key, fan_in, fan_out):
    kw, kb = jax.random.split(key)
    bound = 1.0 / jnp.sqrt(jnp.float32(fan_in))
    w = jax.random.uniform(kw, (fan_in, fan_out), jnp.float32, -bound, bound)
    b = jax.random.uniform(kb, (1, fan_out), jnp.float32, -bound, bound)
    return w, b


def _init_mlp(key, in_dim, out_dim, depth):
    params = []
    dims = [in_dim] + [out_dim] * depth
    keys = jax.random.split(key, depth)
    for i in range(depth):
        w, b = _init_linear(keys[i], dims[i], dims[i + 1])
        params += [w, b]
    return params


def init_encoder_params(key, z=Z_DIM):
    k_src, k_tgt, k_cmb = jax.random.split(key, 3)
    src_params = _init_mlp(k_src, IN_DIM, HIDDEN, SRC_DEPTH)
    tgt_params = _init_mlp(k_tgt, IN_DIM, HIDDEN, TGT_DEPTH)
    cmb_params = _init_mlp(k_cmb, 2 * HIDDEN, z, COMBINE_DEPTH)
    return src_params, tgt_params, cmb_params


# ----------------------------------------------------------------------------
# Parameter packing (trace-time): 20 tensors -> 6 contiguous buffers
# ----------------------------------------------------------------------------
def _pack_params(src_params, tgt_params, cmb_params, z):
    ws0, bs0 = src_params[0], src_params[1]
    wt0, bt0 = tgt_params[0], tgt_params[1]

    # First-layer weights: stacked [source, target], K zero-padded to K_PAD.
    w_first = jnp.zeros((2, K_PAD, HIDDEN), jnp.float32)
    w_first = w_first.at[0, :IN_DIM, :].set(ws0)
    w_first = w_first.at[1, :IN_DIM, :].set(wt0)
    b_first = jnp.concatenate(
        [bs0.reshape(1, HIDDEN), bt0.reshape(1, HIDDEN)], axis=1)   # (1, 128)

    # Hidden layers of both branches packed block-diagonally into 128x128.
    w_hidden = jnp.zeros((N_HIDDEN, FUSED, FUSED), jnp.float32)
    b_hidden = jnp.zeros((N_HIDDEN, 1, FUSED), jnp.float32)
    for i in range(N_HIDDEN):
        ws, bs = src_params[2 * (i + 1)], src_params[2 * (i + 1) + 1]
        wt, bt = tgt_params[2 * (i + 1)], tgt_params[2 * (i + 1) + 1]
        w_hidden = w_hidden.at[i, :HIDDEN, :HIDDEN].set(ws)
        w_hidden = w_hidden.at[i, HIDDEN:, HIDDEN:].set(wt)
        b_hidden = b_hidden.at[i, 0, :HIDDEN].set(bs.reshape(HIDDEN))
        b_hidden = b_hidden.at[i, 0, HIDDEN:].set(bt.reshape(HIDDEN))

    # Combine MLP, output zero-padded to 128 lanes.
    wc0, bc0 = cmb_params[0], cmb_params[1]      # (128, z), (1, z)
    wc1, bc1 = cmb_params[2], cmb_params[3]      # (z, z),   (1, z)
    w_comb = jnp.zeros((COMBINE_DEPTH, FUSED, OUT_PAD), jnp.float32)
    b_comb = jnp.zeros((COMBINE_DEPTH, 1, OUT_PAD), jnp.float32)
    w_comb = w_comb.at[0, :, :z].set(wc0)
    w_comb = w_comb.at[1, :z, :z].set(wc1)
    b_comb = b_comb.at[0, 0, :z].set(bc0.reshape(z))
    b_comb = b_comb.at[1, 0, :z].set(bc1.reshape(z))

    return (w_first.astype(jnp.bfloat16), b_first,
            w_hidden.astype(jnp.bfloat16), b_hidden,
            w_comb.astype(jnp.bfloat16), b_comb)


# ----------------------------------------------------------------------------
# Wrapper
# ----------------------------------------------------------------------------
@functools.partial(jax.jit, static_argnames=("z", "block_b"))
def encoder_forward(source, target, src_params, tgt_params, cmb_params,
                    z=Z_DIM, block_b=256):
    assert SRC_DEPTH == TGT_DEPTH
    batch = source.shape[0]

    # Batch tile: multiple of 8 sublanes, capped so double-buffered bf16 input
    # tiles stay far below v7x's 64 MiB VMEM.
    tb = min(block_b, _round_up(batch, 8))
    padded_b = _round_up(batch, tb)

    def prep(x):
        x = x.reshape(batch, -1).astype(jnp.float32)          # torch .view(B,-1)
        x = jnp.pad(x, ((0, padded_b - batch), (0, K_PAD - IN_DIM)))
        return x.astype(jnp.bfloat16)

    src_flat = prep(source)
    tgt_flat = prep(target)
    w_first, b_first, w_hidden, b_hidden, w_comb, b_comb = _pack_params(
        src_params, tgt_params, cmb_params, z)

    grid = (padded_b // tb,)
    in_specs = [
        pl.BlockSpec((tb, K_PAD), lambda i: (i, 0)),                     # src
        pl.BlockSpec((tb, K_PAD), lambda i: (i, 0)),                     # tgt
        pl.BlockSpec((2, K_PAD, HIDDEN), lambda i: (0, 0, 0)),           # w_first
        pl.BlockSpec((1, FUSED), lambda i: (0, 0)),                      # b_first
        pl.BlockSpec((N_HIDDEN, FUSED, FUSED), lambda i: (0, 0, 0)),     # w_hidden
        pl.BlockSpec((N_HIDDEN, 1, FUSED), lambda i: (0, 0, 0)),         # b_hidden
        pl.BlockSpec((COMBINE_DEPTH, FUSED, OUT_PAD), lambda i: (0, 0, 0)),  # w_comb
        pl.BlockSpec((COMBINE_DEPTH, 1, OUT_PAD), lambda i: (0, 0, 0)),  # b_comb
    ]
    out_specs = pl.BlockSpec((tb, OUT_PAD), lambda i: (i, 0))

    out = pl.pallas_call(
        encoder_kernel,
        out_shape=jax.ShapeDtypeStruct((padded_b, OUT_PAD), jnp.float32),
        grid=grid,
        in_specs=in_specs,
        out_specs=out_specs,
        compiler_params=pltpu.CompilerParams(
            dimension_semantics=("parallel",),
            vmem_limit_bytes=48 * 1024 * 1024,
        ),
    )(src_flat, tgt_flat, w_first, b_first, w_hidden, b_hidden, w_comb, b_comb)

    return out[:batch, :z]


# ----------------------------------------------------------------------------
# Pure-JAX references
# ----------------------------------------------------------------------------
def _mlp_apply(x, params, act_dtype=None):
    n_layers = len(params) // 2
    for i in range(n_layers):
        w, b = params[2 * i], params[2 * i + 1]
        if act_dtype is not None:
            x = x.astype(act_dtype)
            w = w.astype(act_dtype)
        x = jnp.dot(x, w, preferred_element_type=jnp.float32) + b
        if i < n_layers - 1:
            x = jnp.maximum(x, 0.0)
    return x


def _reference_forward(source, target, src_params, tgt_params, cmb_params,
                       act_dtype=None):
    b = source.shape[0]
    x = source.reshape(b, -1).astype(jnp.float32)
    y = target.reshape(b, -1).astype(jnp.float32)
    sc = _mlp_apply(x, src_params, act_dtype)
    tg = _mlp_apply(y, tgt_params, act_dtype)
    return _mlp_apply(jnp.concatenate([sc, tg], axis=1), cmb_params, act_dtype)


# ----------------------------------------------------------------------------
if __name__ == "__main__":
    key = jax.random.PRNGKey(0)
    k_params, k_src, k_tgt, k_src2, k_tgt2 = jax.random.split(key, 5)

    src_params, tgt_params, cmb_params = init_encoder_params(k_params, z=Z_DIM)

    # --- small case (batch=2) ---
    batch = 2
    source = jax.random.normal(k_src, (batch, 3, 28, 28), jnp.float32)
    target = jax.random.normal(k_tgt, (batch, 3, 28, 28), jnp.float32)

    out = encoder_forward(source, target, src_params, tgt_params, cmb_params)
    out = jax.block_until_ready(out)
    assert out.shape == (batch, Z_DIM), out.shape

    ref_bf16 = _reference_forward(source, target, src_params, tgt_params,
                                  cmb_params, act_dtype=jnp.bfloat16)
    ref_f32 = _reference_forward(source, target, src_params, tgt_params,
                                 cmb_params)
    assert jnp.allclose(out, ref_bf16, atol=2e-3, rtol=2e-3), (
        float(jnp.max(jnp.abs(out - ref_bf16))))
    assert jnp.allclose(out, ref_f32, atol=1e-1, rtol=1e-1), (
        float(jnp.max(jnp.abs(out - ref_f32))))

    # --- larger case exercising the batch grid (2 pipelined tiles + padding) ---
    batch2 = 272
    source2 = jax.random.normal(k_src2, (batch2, 3, 28, 28), jnp.float32)
    target2 = jax.random.normal(k_tgt2, (batch2, 3, 28, 28), jnp.float32)
    out2 = jax.block_until_ready(
        encoder_forward(source2, target2, src_params, tgt_params, cmb_params))
    ref2 = _reference_forward(source2, target2, src_params, tgt_params,
                              cmb_params, act_dtype=jnp.bfloat16)
    assert out2.shape == (batch2, Z_DIM), out2.shape
    assert jnp.allclose(out2, ref2, atol=2e-3, rtol=2e-3), (
        float(jnp.max(jnp.abs(out2 - ref2))))

    print("KERNEL_OK")
</pallas_src>

<mosaic_0001>
module attributes {stable_mosaic.version = 11 : i64} {
  func.func @encoder_kernel(%arg0: i32, %arg1: memref<8x2432xbf16, #tpu.memory_space<vmem>>, %arg2: memref<8x2432xbf16, #tpu.memory_space<vmem>>, %arg3: memref<2x2432x64xbf16, #tpu.memory_space<vmem>>, %arg4: memref<1x128xf32, #tpu.memory_space<vmem>>, %arg5: memref<3x128x128xbf16, #tpu.memory_space<vmem>>, %arg6: memref<3x1x128xf32, #tpu.memory_space<vmem>>, %arg7: memref<2x128x128xbf16, #tpu.memory_space<vmem>>, %arg8: memref<2x1x128xf32, #tpu.memory_space<vmem>>, %arg9: memref<8x128xf32, #tpu.memory_space<vmem>>) attributes {dimension_semantics = [#tpu.dimension_semantics<parallel>], iteration_bounds = array<i64: 1>, scalar_prefetch = 0 : i64, scratch_operands = 0 : i64, tpu.core_type = #tpu.core_type<tc>, window_params = [{transform_indices = @transform_0, window_bounds = array<i64: 8, 2432>}, {transform_indices = @transform_1, window_bounds = array<i64: 8, 2432>}, {pipeline_mode = #tpu.pipeline_mode<synchronous>, transform_indices = @transform_2, window_bounds = array<i64: 2, 2432, 64>}, {pipeline_mode = #tpu.pipeline_mode<synchronous>, transform_indices = @transform_3, window_bounds = array<i64: 1, 128>}, {pipeline_mode = #tpu.pipeline_mode<synchronous>, transform_indices = @transform_4, window_bounds = array<i64: 3, 128, 128>}, {pipeline_mode = #tpu.pipeline_mode<synchronous>, transform_indices = @transform_5, window_bounds = array<i64: 3, 1, 128>}, {pipeline_mode = #tpu.pipeline_mode<synchronous>, transform_indices = @transform_6, window_bounds = array<i64: 2, 128, 128>}, {pipeline_mode = #tpu.pipeline_mode<synchronous>, transform_indices = @transform_7, window_bounds = array<i64: 2, 1, 128>}, {transform_indices = @transform_8, window_bounds = array<i64: 8, 128>}]} {
    %c0 = arith.constant 0 : index
    %c0_0 = arith.constant 0 : index
    %0 = vector.load %arg1[%c0, %c0_0] : memref<8x2432xbf16, #tpu.memory_space<vmem>>, vector<8x2432xbf16>
    %c0_1 = arith.constant 0 : index
    %c0_2 = arith.constant 0 : index
    %c0_3 = arith.constant 0 : index
    %1 = vector.load %arg3[%c0_1, %c0_2, %c0_3] : memref<2x2432x64xbf16, #tpu.memory_space<vmem>>, vector<1x2432x64xbf16>
    %2 = vector.shape_cast %1 : vector<1x2432x64xbf16> to vector<2432x64xbf16>
    %cst = arith.constant dense<0.000000e+00> : vector<8x64xf32>
    %3 = tpu.matmul %0, %2, %cst {dimension_numbers = #tpu.dot_dimension_numbers<[1], [0], [0], [1], [0, 0, 1, 1], [], []>} : vector<8x2432xbf16>, vector<2432x64xbf16>, vector<8x64xf32> -> vector<8x64xf32>
    %c0_4 = arith.constant 0 : index
    %c0_5 = arith.constant 0 : index
    %4 = vector.load %arg2[%c0_4, %c0_5] : memref<8x2432xbf16, #tpu.memory_space<vmem>>, vector<8x2432xbf16>
    %c1 = arith.constant 1 : index
    %c0_6 = arith.constant 0 : index
    %c0_7 = arith.constant 0 : index
    %5 = vector.load %arg3[%c1, %c0_6, %c0_7] : memref<2x2432x64xbf16, #tpu.memory_space<vmem>>, vector<1x2432x64xbf16>
    %6 = vector.shape_cast %5 : vector<1x2432x64xbf16> to vector<2432x64xbf16>
    %cst_8 = arith.constant dense<0.000000e+00> : vector<8x64xf32>
    %7 = tpu.matmul %4, %6, %cst_8 {dimension_numbers = #tpu.dot_dimension_numbers<[1], [0], [0], [1], [0, 0, 1, 1], [], []>} : vector<8x2432xbf16>, vector<2432x64xbf16>, vector<8x64xf32> -> vector<8x64xf32>
    %8 = tpu.concatenate %3, %7 in 1 : vector<8x64xf32>, vector<8x64xf32> -> vector<8x128xf32>
    %c0_9 = arith.constant 0 : index
    %c0_10 = arith.constant 0 : index
    %9 = vector.load %arg4[%c0_9, %c0_10] : memref<1x128xf32, #tpu.memory_space<vmem>>, vector<1x128xf32>
    %10 = vector.broadcast %9 : vector<1x128xf32> to vector<8x128xf32>
    %11 = arith.addf %8, %10 : vector<8x128xf32>
    %cst_11 = arith.constant 0.000000e+00 : f32
    %12 = vector.broadcast %cst_11 : f32 to vector<8x128xf32>
    %13 = arith.maximumf %11, %12 : vector<8x128xf32>
    %14 = arith.truncf %13 : vector<8x128xf32> to vector<8x128xbf16>
    %c0_12 = arith.constant 0 : index
    %c0_13 = arith.constant 0 : index
    %c0_14 = arith.constant 0 : index
    %15 = vector.load %arg5[%c0_12, %c0_13, %c0_14] : memref<3x128x128xbf16, #tpu.memory_space<vmem>>, vector<1x128x128xbf16>
    %16 = vector.shape_cast %15 : vector<1x128x128xbf16> to vector<128x128xbf16>
    %cst_15 = arith.constant dense<0.000000e+00> : vector<8x128xf32>
    %17 = tpu.matmul %14, %16, %cst_15 {dimension_numbers = #tpu.dot_dimension_numbers<[1], [0], [0], [1], [0, 0, 1, 1], [], []>} : vector<8x128xbf16>, vector<128x128xbf16>, vector<8x128xf32> -> vector<8x128xf32>
    %c0_16 = arith.constant 0 : index
    %c0_17 = arith.constant 0 : index
    %c0_18 = arith.constant 0 : index
    %18 = vector.load %arg6[%c0_16, %c0_17, %c0_18] : memref<3x1x128xf32, #tpu.memory_space<vmem>>, vector<1x1x128xf32>
    %19 = vector.shape_cast %18 : vector<1x1x128xf32> to vector<1x128xf32>
    %20 = vector.broadcast %19 : vector<1x128xf32> to vector<8x128xf32>
    %21 = arith.addf %17, %20 : vector<8x128xf32>
    %cst_19 = arith.constant 0.000000e+00 : f32
    %22 = vector.broadcast %cst_19 : f32 to vector<8x128xf32>
    %23 = arith.maximumf %21, %22 : vector<8x128xf32>
    %24 = arith.truncf %23 : vector<8x128xf32> to vector<8x128xbf16>
    %c1_20 = arith.constant 1 : index
    %c0_21 = arith.constant 0 : index
    %c0_22 = arith.constant 0 : index
    %25 = vector.load %arg5[%c1_20, %c0_21, %c0_22] : memref<3x128x128xbf16, #tpu.memory_space<vmem>>, vector<1x128x128xbf16>
    %26 = vector.shape_cast %25 : vector<1x128x128xbf16> to vector<128x128xbf16>
    %cst_23 = arith.constant dense<0.000000e+00> : vector<8x128xf32>
    %27 = tpu.matmul %24, %26, %cst_23 {dimension_numbers = #tpu.dot_dimension_numbers<[1], [0], [0], [1], [0, 0, 1, 1], [], []>} : vector<8x128xbf16>, vector<128x128xbf16>, vector<8x128xf32> -> vector<8x128xf32>
    %c1_24 = arith.constant 1 : index
    %c0_25 = arith.constant 0 : index
    %c0_26 = arith.constant 0 : index
    %28 = vector.load %arg6[%c1_24, %c0_25, %c0_26] : memref<3x1x128xf32, #tpu.memory_space<vmem>>, vector<1x1x128xf32>
    %29 = vector.shape_cast %28 : vector<1x1x128xf32> to vector<1x128xf32>
    %30 = vector.broadcast %29 : vector<1x128xf32> to vector<8x128xf32>
    %31 = arith.addf %27, %30 : vector<8x128xf32>
    %cst_27 = arith.constant 0.000000e+00 : f32
    %32 = vector.broadcast %cst_27 : f32 to vector<8x128xf32>
    %33 = arith.maximumf %31, %32 : vector<8x128xf32>
    %34 = arith.truncf %33 : vector<8x128xf32> to vector<8x128xbf16>
    %c2 = arith.constant 2 : index
    %c0_28 = arith.constant 0 : index
    %c0_29 = arith.constant 0 : index
    %35 = vector.load %arg5[%c2, %c0_28, %c0_29] : memref<3x128x128xbf16, #tpu.memory_space<vmem>>, vector<1x128x128xbf16>
    %36 = vector.shape_cast %35 : vector<1x128x128xbf16> to vector<128x128xbf16>
    %cst_30 = arith.constant dense<0.000000e+00> : vector<8x128xf32>
    %37 = tpu.matmul %34, %36, %cst_30 {dimension_numbers = #tpu.dot_dimension_numbers<[1], [0], [0], [1], [0, 0, 1, 1], [], []>} : vector<8x128xbf16>, vector<128x128xbf16>, vector<8x128xf32> -> vector<8x128xf32>
    %c2_31 = arith.constant 2 : index
    %c0_32 = arith.constant 0 : index
    %c0_33 = arith.constant 0 : index
    %38 = vector.load %arg6[%c2_31, %c0_32, %c0_33] : memref<3x1x128xf32, #tpu.memory_space<vmem>>, vector<1x1x128xf32>
    %39 = vector.shape_cast %38 : vector<1x1x128xf32> to vector<1x128xf32>
    %40 = vector.broadcast %39 : vector<1x128xf32> to vector<8x128xf32>
    %41 = arith.addf %37, %40 : vector<8x128xf32>
    %42 = arith.truncf %41 : vector<8x128xf32> to vector<8x128xbf16>
    %c0_34 = arith.constant 0 : index
    %c0_35 = arith.constant 0 : index
    %c0_36 = arith.constant 0 : index
    %43 = vector.load %arg7[%c0_34, %c0_35, %c0_36] : memref<2x128x128xbf16, #tpu.memory_space<vmem>>, vector<1x128x128xbf16>
    %44 = vector.shape_cast %43 : vector<1x128x128xbf16> to vector<128x128xbf16>
    %cst_37 = arith.constant dense<0.000000e+00> : vector<8x128xf32>
    %45 = tpu.matmul %42, %44, %cst_37 {dimension_numbers = #tpu.dot_dimension_numbers<[1], [0], [0], [1], [0, 0, 1, 1], [], []>} : vector<8x128xbf16>, vector<128x128xbf16>, vector<8x128xf32> -> vector<8x128xf32>
    %c0_38 = arith.constant 0 : index
    %c0_39 = arith.constant 0 : index
    %c0_40 = arith.constant 0 : index
    %46 = vector.load %arg8[%c0_38, %c0_39, %c0_40] : memref<2x1x128xf32, #tpu.memory_space<vmem>>, vector<1x1x128xf32>
    %47 = vector.shape_cast %46 : vector<1x1x128xf32> to vector<1x128xf32>
    %48 = vector.broadcast %47 : vector<1x128xf32> to vector<8x128xf32>
    %49 = arith.addf %45, %48 : vector<8x128xf32>
    %cst_41 = arith.constant 0.000000e+00 : f32
    %50 = vector.broadcast %cst_41 : f32 to vector<8x128xf32>
    %51 = arith.maximumf %49, %50 : vector<8x128xf32>
    %52 = arith.truncf %51 : vector<8x128xf32> to vector<8x128xbf16>
    %c1_42 = arith.constant 1 : index
    %c0_43 = arith.constant 0 : index
    %c0_44 = arith.constant 0 : index
    %53 = vector.load %arg7[%c1_42, %c0_43, %c0_44] : memref<2x128x128xbf16, #tpu.memory_space<vmem>>, vector<1x128x128xbf16>
    %54 = vector.shape_cast %53 : vector<1x128x128xbf16> to vector<128x128xbf16>
    %cst_45 = arith.constant dense<0.000000e+00> : vector<8x128xf32>
    %55 = tpu.matmul %52, %54, %cst_45 {dimension_numbers = #tpu.dot_dimension_numbers<[1], [0], [0], [1], [0, 0, 1, 1], [], []>} : vector<8x128xbf16>, vector<128x128xbf16>, vector<8x128xf32> -> vector<8x128xf32>
    %c1_46 = arith.constant 1 : index
    %c0_47 = arith.constant 0 : index
    %c0_48 = arith.constant 0 : index
    %56 = vector.load %arg8[%c1_46, %c0_47, %c0_48] : memref<2x1x128xf32, #tpu.memory_space<vmem>>, vector<1x1x128xf32>
    %57 = vector.shape_cast %56 : vector<1x1x128xf32> to vector<1x128xf32>
    %58 = vector.broadcast %57 : vector<1x128xf32> to vector<8x128xf32>
    %59 = arith.addf %55, %58 : vector<8x128xf32>
    %c0_49 = arith.constant 0 : index
    %c0_50 = arith.constant 0 : index
    %60 = vector.load %arg9[%c0_49, %c0_50] : memref<8x128xf32, #tpu.memory_space<vmem>>, vector<8x128xf32>
    tpu.vector_store %arg9[%c0_49, %c0_50], %59 {strides = array<i32>} : memref<8x128xf32, #tpu.memory_space<vmem>>, vector<8x128xf32>,
    return
  }
  func.func @transform_0(%arg0: i32) -> (i32, i32) {
    %c0_i32 = arith.constant 0 : i32
    %c0_i32_0 = arith.constant 0 : i32
    return %arg0, %c0_i32 : i32, i32
  }
  func.func @transform_1(%arg0: i32) -> (i32, i32) {
    %c0_i32 = arith.constant 0 : i32
    %c0_i32_0 = arith.constant 0 : i32
    return %arg0, %c0_i32 : i32, i32
  }
  func.func @transform_2(%arg0: i32) -> (i32, i32, i32) {
    %c0_i32 = arith.constant 0 : i32
    %c0_i32_0 = arith.constant 0 : i32
    %c0_i32_1 = arith.constant 0 : i32
    %c0_i32_2 = arith.constant 0 : i32
    return %c0_i32, %c0_i32_0, %c0_i32_1 : i32, i32, i32
  }
  func.func @transform_3(%arg0: i32) -> (i32, i32) {
    %c0_i32 = arith.constant 0 : i32
    %c0_i32_0 = arith.constant 0 : i32
    %c0_i32_1 = arith.constant 0 : i32
    return %c0_i32, %c0_i32_0 : i32, i32
  }
  func.func @transform_4(%arg0: i32) -> (i32, i32, i32) {
    %c0_i32 = arith.constant 0 : i32
    %c0_i32_0 = arith.constant 0 : i32
    %c0_i32_1 = arith.constant 0 : i32
    %c0_i32_2 = arith.constant 0 : i32
    return %c0_i32, %c0_i32_0, %c0_i32_1 : i32, i32, i32
  }
  func.func @transform_5(%arg0: i32) -> (i32, i32, i32) {
    %c0_i32 = arith.constant 0 : i32
    %c0_i32_0 = arith.constant 0 : i32
    %c0_i32_1 = arith.constant 0 : i32
    %c0_i32_2 = arith.constant 0 : i32
    return %c0_i32, %c0_i32_0, %c0_i32_1 : i32, i32, i32
  }
  func.func @transform_6(%arg0: i32) -> (i32, i32, i32) {
    %c0_i32 = arith.constant 0 : i32
    %c0_i32_0 = arith.constant 0 : i32
    %c0_i32_1 = arith.constant 0 : i32
    %c0_i32_2 = arith.constant 0 : i32
    return %c0_i32, %c0_i32_0, %c0_i32_1 : i32, i32, i32
  }
  func.func @transform_7(%arg0: i32) -> (i32, i32, i32) {
    %c0_i32 = arith.constant 0 : i32
    %c0_i32_0 = arith.constant 0 : i32
    %c0_i32_1 = arith.constant 0 : i32
    %c0_i32_2 = arith.constant 0 : i32
    return %c0_i32, %c0_i32_0, %c0_i32_1 : i32, i32, i32
  }
  func.func @transform_8(%arg0: i32) -> (i32, i32) {
    %c0_i32 = arith.constant 0 : i32
    %c0_i32_0 = arith.constant 0 : i32
    return %arg0, %c0_i32 : i32, i32
  }
}

</mosaic_0001>

<bundles_post_ra>
// kernel: encoder_forward.1
= control target key start
LH: loop header
LB: loop body
LE: loop exit
PB: predicated region body
PF: predicated region fallthrough
CT: control target
= control target key end

     0   :  { %vm5734_vm0 = vmmov 0   ;;  %s5735_s18 = smov 64   ;;  %vm3421_vm1 = vcmask 523264   ;;  %s6973_s2 = inlined_call_operand.vmem [shape: bf16[2,2432,64], index: 2, kind: input, shape index: {}]   ;;  %s6974_s0 = inlined_call_operand.vmem [shape: bf16[8,2432], index: 0, kind: input, shape index: {}]   ;;  %s6975_s1 = inlined_call_operand.vmem [shape: bf16[8,2432], index: 1, kind: input, shape index: {}]   ;;  %s6976_s4 = inlined_call_operand.vmem [shape: bf16[3,128,128], index: 4, kind: input, shape index: {}]   ;;  %s6977_s3 = inlined_call_operand.vmem [shape: f32[1,128], index: 3, kind: input, shape index: {}]   ;;  %s6978_s5 = inlined_call_operand.vmem [shape: f32[3,1,128], index: 5, kind: input, shape index: {}]   ;;  %s6979_s6 = inlined_call_operand.vmem [shape: bf16[2,128,128], index: 6, kind: input, shape index: {}]   ;;  %s6980_s7 = inlined_call_operand.vmem [shape: f32[2,1,128], index: 7, kind: input, shape index: {}]   ;;  %s6981_s8 = inlined_call_operand.vmem [shape: f32[8,128], index: 8, kind: output, shape index: {}]  }
   0x1   :  { %v5351_v0 = vld [vmem:[%s6973_s2 + $0x40] sm:$0xff]   ;;  %v5355_v4 = vld [vmem:[%s6973_s2 + $0x48] sm:$0xff]   ;;  %v5359_v8 = vld [vmem:[%s6973_s2 + $0x50] sm:$0xff]  }
   0x2   :  { %v5352_v1 = vld [vmem:[%s6973_s2 + $0xc0] sm:$0xff]   ;;  %4749 = vmatprep.subr.bf16.mxu0 %v5351_v0  ;;  %v5356_v5 = vld [vmem:[%s6973_s2 + $0xc8] sm:$0xff]   ;;  %v5360_v9 = vld [vmem:[%s6973_s2 + $0xd0] sm:$0xff]  }
   0x3   :  { %v5353_v2 = vld [vmem:[%s6973_s2] sm:$0xff]   ;;  %4771 = vmatprep.subr.bf16.mxu1 %v5352_v1  ;;  %v5357_v6 = vld [vmem:[%s6973_s2 + $0x8] sm:$0xff]   ;;  %v5361_v10 = vld [vmem:[%s6973_s2 + $0x10] sm:$0xff]  }
   0x4   :  { %v5354_v3 = vld [vmem:[%s6973_s2 + $0x80] sm:$0xff]   ;;  %4750 = vmatpush3.bf16.msra.mxu0 %v5353_v2  ;;  %v5358_v7 = vld [vmem:[%s6973_s2 + $0x88] sm:$0xff]   ;;  %v5362_v11 = vld [vmem:[%s6973_s2 + $0x90] sm:$0xff]  }
   0x5   :  { %4772 = vmatpush3.bf16.msra.mxu1 %v5354_v3  ;;  %4751 = vmatprep.subr.bf16.mxu0 %v5355_v4  ;;  %v5363_v12 = vld [vmem:[%s6973_s2 + $0x58] sm:$0xff]   ;;  %v5367_v16 = vld [vmem:[%s6973_s2 + $0x60] sm:$0xff]   ;;  %v5371_v20 = vld [vmem:[%s6973_s2 + $0x68] sm:$0xff]  }
   0x6   :  { %4773 = vmatprep.subr.bf16.mxu1 %v5356_v5  ;;  %v5364_v13 = vld [vmem:[%s6973_s2 + $0xd8] sm:$0xff]   ;;  %v5368_v17 = vld [vmem:[%s6973_s2 + $0xe0] sm:$0xff]   ;;  %v5372_v21 = vld [vmem:[%s6973_s2 + $0xe8] sm:$0xff]  }
   0x7   :  { %v5365_v14 = vld [vmem:[%s6973_s2 + $0x18] sm:$0xff]   ;;  %v5369_v18 = vld [vmem:[%s6973_s2 + $0x20] sm:$0xff]   ;;  %v5373_v22 = vld [vmem:[%s6973_s2 + $0x28] sm:$0xff]  }
   0x8   :  { %4752 = vmatpush3.bf16.msra.mxu0 %v5357_v6  ;;  %v5366_v15 = vld [vmem:[%s6973_s2 + $0x98] sm:$0xff]   ;;  %v5370_v19 = vld [vmem:[%s6973_s2 + $0xa0] sm:$0xff]   ;;  %v5374_v23 = vld [vmem:[%s6973_s2 + $0xa8] sm:$0xff]  }
   0x9   :  { %4774 = vmatpush3.bf16.msra.mxu1 %v5358_v7  ;;  %4753 = vmatprep.subr.bf16.mxu0 %v5359_v8  ;;  %v5375_v24 = vld [vmem:[%s6973_s2 + $0x70] sm:$0xff]   ;;  %v5379_v28 = vld [vmem:[%s6973_s2 + $0x78] sm:$0xff]   ;;  %v30_v32 = vld [vmem:[%s6974_s0] sm:$0xff] }
   0xa   :  { %4775 = vmatprep.subr.bf16.mxu1 %v5360_v9  ;;  %v5376_v25 = vld [vmem:[%s6973_s2 + $0xf0] sm:$0xff]   ;;  %v5380_v29 = vld [vmem:[%s6973_s2 + $0xf8] sm:$0xff]   ;;  %v31_v33 = vld [vmem:[%s6974_s0 + $0x8] sm:$0xff]  ;;  %v4006_v34 = vcombine.low %v30_v32, %v30_v32  ;;  %v4007_v35 = vcombine.high %v30_v32, %v30_v32 }
   0xb   :  { %v5377_v26 = vld [vmem:[%s6973_s2 + $0x30] sm:$0xff]   ;;  %v5381_v30 = vld [vmem:[%s6973_s2 + $0x38] sm:$0xff]   ;;  %v4008_v36 = vcombine.low %v31_v33, %v31_v33  ;;  %v4009_v37 = vcombine.high %v31_v33, %v31_v33  ;;  %v5387_v38 = vld [vmem:[%s6973_s2 + $0x140] sm:$0xff]  }
   0xc   :  { %4754 = vmatpush3.bf16.msra.mxu0 %v5361_v10  ;;  %v5378_v27 = vld [vmem:[%s6973_s2 + $0xb0] sm:$0xff]   ;;  %v5382_v31 = vld [vmem:[%s6973_s2 + $0xb8] sm:$0xff]   ;;  %v5388_v39 = vld [vmem:[%s6973_s2 + $0x1c0] sm:$0xff]   ;;  %1355 = vmatprep.mubr.bf16.mxu0 %v4007_v35 }
   0xd   :  { %4776 = vmatpush3.bf16.msra.mxu1 %v5362_v11  ;;  %4755 = vmatprep.subr.bf16.mxu0 %v5363_v12  ;;  %v5389_v40 = vld [vmem:[%s6973_s2 + $0x100] sm:$0xff]   ;;  %v5391_v42 = vld [vmem:[%s6973_s2 + $0x148] sm:$0xff]   ;;  %v5395_v46 = vld [vmem:[%s6973_s2 + $0x150] sm:$0xff]  }
   0xe   :  { %4777 = vmatprep.subr.bf16.mxu1 %v5364_v13  ;;  %1395 = vmatprep.mubr.bf16.mxu1 %v4009_v37  ;;  %v5390_v41 = vld [vmem:[%s6973_s2 + $0x180] sm:$0xff]   ;;  %v5392_v43 = vld [vmem:[%s6973_s2 + $0x1c8] sm:$0xff]   ;;  %v5396_v47 = vld [vmem:[%s6973_s2 + $0x1d0] sm:$0xff]  }
   0xf   :  { %v5393_v44 = vld [vmem:[%s6973_s2 + $0x108] sm:$0xff]   ;;  %v5397_v48 = vld [vmem:[%s6973_s2 + $0x110] sm:$0xff]   ;;  %v5399_v50 = vld [vmem:[%s6973_s2 + $0x158] sm:$0xff]  }
  0x10   :  { %4756 = vmatpush3.bf16.msra.mxu0 %v5365_v14  ;;  %v5394_v45 = vld [vmem:[%s6973_s2 + $0x188] sm:$0xff]   ;;  %v5398_v49 = vld [vmem:[%s6973_s2 + $0x190] sm:$0xff]   ;;  %v5400_v51 = vld [vmem:[%s6973_s2 + $0x1d8] sm:$0xff]  }
  0x11   :  { %4778 = vmatpush3.bf16.msra.mxu1 %v5366_v15  ;;  %4757 = vmatprep.subr.bf16.mxu0 %v5367_v16  ;;  %v5401_v52 = vld [vmem:[%s6973_s2 + $0x118] sm:$0xff]   ;;  %v5403_v54 = vld [vmem:[%s6973_s2 + $0x160] sm:$0xff]   ;;  %v5407_v58 = vld [vmem:[%s6973_s2 + $0x168] sm:$0xff]  }
  0x12   :  { %4779 = vmatprep.subr.bf16.mxu1 %v5368_v17  ;;  %v5402_v53 = vld [vmem:[%s6973_s2 + $0x198] sm:$0xff]   ;;  %v5404_v55 = vld [vmem:[%s6973_s2 + $0x1e0] sm:$0xff]   ;;  %v5408_v59 = vld [vmem:[%s6973_s2 + $0x1e8] sm:$0xff]  }
  0x13   :  { %v5405_v56 = vld [vmem:[%s6973_s2 + $0x120] sm:$0xff]   ;;  %v5409_v60 = vld [vmem:[%s6973_s2 + $0x128] sm:$0xff]   ;;  %v5411_v62 = vld [vmem:[%s6973_s2 + $0x170] sm:$0xff]  }
  0x14   :  { %4758 = vmatpush3.bf16.msra.mxu0 %v5369_v18  ;;  %v5406_v57 = vld [vmem:[%s6973_s2 + $0x1a0] sm:$0xff]   ;;  %v5410_v61 = vld [vmem:[%s6973_s2 + $0x1a8] sm:$0xff]   ;;  %v5412_v63 = vld [vmem:[%s6973_s2 + $0x1f0] sm:$0xff]  }
  0x15   :  { %4780 = vmatpush3.bf16.msra.mxu1 %v5370_v19  ;;  %4759 = vmatprep.subr.bf16.mxu0 %v5371_v20  ;;  %v5413_v0 = vld [vmem:[%s6973_s2 + $0x130] sm:$0xff]   ;;  %v5415_v2 = vld [vmem:[%s6973_s2 + $0x178] sm:$0xff]   ;;  %v5423_v12 = vld [vmem:[%s6973_s2 + $0x240] sm:$0xff]  }
  0x16   :  { %4781 = vmatprep.subr.bf16.mxu1 %v5372_v21  ;;  %v5414_v1 = vld [vmem:[%s6973_s2 + $0x1b0] sm:$0xff]   ;;  %v5416_v3 = vld [vmem:[%s6973_s2 + $0x1f8] sm:$0xff]   ;;  %v5424_v13 = vld [vmem:[%s6973_s2 + $0x2c0] sm:$0xff]  }
  0x17   :  { %v5417_v4 = vld [vmem:[%s6973_s2 + $0x138] sm:$0xff]   ;;  %v32_v6 = vld [vmem:[%s6974_s0 + $0x10] sm:$0xff]  ;;  %v5425_v14 = vld [vmem:[%s6973_s2 + $0x200] sm:$0xff]  }
  0x18   :  { %4760 = vmatpush3.bf16.msra.mxu0 %v5373_v22  ;;  %v5418_v5 = vld [vmem:[%s6973_s2 + $0x1b8] sm:$0xff]   ;;  %v4010_v7 = vcombine.low %v32_v6, %v32_v6  ;;  %v4011_v8 = vcombine.high %v32_v6, %v32_v6  ;;  %v5426_v15 = vld [vmem:[%s6973_s2 + $0x280] sm:$0xff]   ;;  %v5427_v16 = vld [vmem:[%s6973_s2 + $0x248] sm:$0xff]  }
  0x19   :  { %4782 = vmatpush3.bf16.msra.mxu1 %v5374_v23  ;;  %4761 = vmatprep.subr.bf16.mxu0 %v5375_v24  ;;  %v33_v9 = vld [vmem:[%s6974_s0 + $0x18] sm:$0xff]  ;;  %v5428_v17 = vld [vmem:[%s6973_s2 + $0x2c8] sm:$0xff]   ;;  %v5431_v20 = vld [vmem:[%s6973_s2 + $0x250] sm:$0xff]  }
  0x1a   :  { %4783 = vmatprep.subr.bf16.mxu1 %v5376_v25  ;;  %v4012_v10 = vcombine.low %v33_v9, %v33_v9  ;;  %v4013_v11 = vcombine.high %v33_v9, %v33_v9  ;;  %v5429_v18 = vld [vmem:[%s6973_s2 + $0x208] sm:$0xff]   ;;  %v5432_v21 = vld [vmem:[%s6973_s2 + $0x2d0] sm:$0xff]   ;;  %v5435_v24 = vld [vmem:[%s6973_s2 + $0x258] sm:$0xff]  }
  0x1b   :  { %v5430_v19 = vld [vmem:[%s6973_s2 + $0x288] sm:$0xff]   ;;  %v5433_v22 = vld [vmem:[%s6973_s2 + $0x210] sm:$0xff]   ;;  %v5436_v25 = vld [vmem:[%s6973_s2 + $0x2d8] sm:$0xff]  }
  0x1c   :  { %4762 = vmatpush3.bf16.msra.mxu0 %v5377_v26  ;;  %v5434_v23 = vld [vmem:[%s6973_s2 + $0x290] sm:$0xff]   ;;  %v5437_v26 = vld [vmem:[%s6973_s2 + $0x218] sm:$0xff]   ;;  %v5443_v32 = vld [vmem:[%s6973_s2 + $0x268] sm:$0xff]  }
  0x1d   :  { %4784 = vmatpush3.bf16.msra.mxu1 %v5378_v27  ;;  %4763 = vmatprep.subr.bf16.mxu0 %v5379_v28  ;;  %v5438_v27 = vld [vmem:[%s6973_s2 + $0x298] sm:$0xff]   ;;  %v5439_v28 = vld [vmem:[%s6973_s2 + $0x260] sm:$0xff]   ;;  %v5444_v33 = vld [vmem:[%s6973_s2 + $0x2e8] sm:$0xff]  }
  0x1e   :  { %4785 = vmatprep.subr.bf16.mxu1 %v5380_v29  ;;  %v5440_v29 = vld [vmem:[%s6973_s2 + $0x2e0] sm:$0xff]   ;;  %v5446_v35 = vld [vmem:[%s6973_s2 + $0x2a8] sm:$0xff]   ;;  %v5448_v37 = vld [vmem:[%s6973_s2 + $0x2f0] sm:$0xff]  }
  0x1f   :  { %v5479_v6 = vld [vmem:[%s6973_s2 + $0x368] sm:$0xff]  }
  0x20   :  { %4764 = vmatpush3.bf16.msra.mxu0 %v5381_v30  ;;  %v5441_v30 = vld [vmem:[%s6973_s2 + $0x220] sm:$0xff]   ;;  %v5482_v9 = vld [vmem:[%s6973_s2 + $0x3a8] sm:$0xff]  }
  0x21   :  { %4786 = vmatpush3.bf16.msra.mxu1 %v5382_v31  ;;  %4793 = vmatprep.subr.bf16.mxu0 %v5387_v38  ;;  %v5442_v31 = vld [vmem:[%s6973_s2 + $0x2a0] sm:$0xff]   ;;  %v5449_v38 = vld [vmem:[%s6973_s2 + $0x230] sm:$0xff]  }
  0x22   :  { %4815 = vmatprep.subr.bf16.mxu1 %v5388_v39  ;;  %v5450_v39 = vld [vmem:[%s6973_s2 + $0x2b0] sm:$0xff]  }
  0x23   :  { %1356 = vmatmul.mubr.bf16.vlgmr.msra.gmra.mrb[0].mxu0 %v4006_v34  ;;  %v5445_v34 = vld [vmem:[%s6973_s2 + $0x228] sm:$0xff]  }
  0x24   :  { %1396 = vmatmul.mubr.bf16.vlgmr.msra.gmra.mrb[0].mxu1 %v4008_v36  ;;  %4794 = vmatpush3.bf16.msra.mxu0 %v5389_v40  ;;  %v5447_v36 = vld [vmem:[%s6973_s2 + $0x270] sm:$0xff]   ;;  %v5451_v40 = vld [vmem:[%s6973_s2 + $0x278] sm:$0xff]  }
  0x25   :  { %4816 = vmatpush3.bf16.msra.mxu1 %v5390_v41  ;;  %4795 = vmatprep.subr.bf16.mxu0 %v5391_v42  ;;  %v5452_v41 = vld [vmem:[%s6973_s2 + $0x2f8] sm:$0xff]  }
  0x26   :  { %4817 = vmatprep.subr.bf16.mxu1 %v5392_v43  ;;  %1435 = vmatprep.mubr.bf16.mxu0 %v4011_v8  ;;  %v5453_v42 = vld [vmem:[%s6973_s2 + $0x238] sm:$0xff]   ;;  %v5481_v8 = vld [vmem:[%s6973_s2 + $0x328] sm:$0xff]  }
  0x27   :  { %1475 = vmatprep.mubr.bf16.mxu1 %v4013_v11  ;;  %v5454_v43 = vld [vmem:[%s6973_s2 + $0x2b8] sm:$0xff]   ;;  %v5484_v11 = vld [vmem:[%s6973_s2 + $0x3f0] sm:$0xff]  }
  0x28   :  { %4796 = vmatpush3.bf16.msra.mxu0 %v5393_v44  ;;  %v34_v44 = vld [vmem:[%s6974_s0 + $0x20] sm:$0xff] }
  0x29   :  { %4818 = vmatpush3.bf16.msra.mxu1 %v5394_v45  ;;  %4797 = vmatprep.subr.bf16.mxu0 %v5395_v46  ;;  %v35_v45 = vld [vmem:[%s6974_s0 + $0x28] sm:$0xff]  ;;  %v4014_v46 = vcombine.low %v34_v44, %v34_v44 }
  0x2a   :  { %4819 = vmatprep.subr.bf16.mxu1 %v5396_v47  ;;  %v4015_v47 = vcombine.high %v34_v44, %v34_v44  ;;  %v5514_v44 = vld [vmem:[%s6973_s2 + $0x430] sm:$0xff]  }
  0x2c   :  { %4798 = vmatpush3.bf16.msra.mxu0 %v5397_v48  ;;  %v4016_v48 = vcombine.low %v35_v45, %v35_v45 }
  0x2d   :  { %4820 = vmatpush3.bf16.msra.mxu1 %v5398_v49  ;;  %4799 = vmatprep.subr.bf16.mxu0 %v5399_v50  ;;  %v4017_v49 = vcombine.high %v35_v45, %v35_v45  ;;  %v5459_v50 = vld [vmem:[%s6973_s2 + $0x340] sm:$0xff]  }
  0x2e   :  { %4821 = vmatprep.subr.bf16.mxu1 %v5400_v51  ;;  %v5460_v51 = vld [vmem:[%s6973_s2 + $0x3c0] sm:$0xff]  }
  0x2f   :  { %v38_v45 = vld [vmem:[%s6974_s0 + $0x40] sm:$0xff] }
  0x30   :  { %4800 = vmatpush3.bf16.msra.mxu0 %v5401_v52  ;;  %v5461_v52 = vld [vmem:[%s6973_s2 + $0x300] sm:$0xff]  }
  0x31   :  { %4822 = vmatpush3.bf16.msra.mxu1 %v5402_v53  ;;  %4801 = vmatprep.subr.bf16.mxu0 %v5403_v54  ;;  %v5462_v53 = vld [vmem:[%s6973_s2 + $0x380] sm:$0xff]   ;;  %v5463_v54 = vld [vmem:[%s6973_s2 + $0x348] sm:$0xff]  }
  0x32   :  { %4823 = vmatprep.subr.bf16.mxu1 %v5404_v55  ;;  %v5464_v55 = vld [vmem:[%s6973_s2 + $0x3c8] sm:$0xff]  }
  0x34   :  { %4802 = vmatpush3.bf16.msra.mxu0 %v5405_v56  ;;  %v5465_v56 = vld [vmem:[%s6973_s2 + $0x308] sm:$0xff]  }
  0x35   :  { %4824 = vmatpush3.bf16.msra.mxu1 %v5406_v57  ;;  %4803 = vmatprep.subr.bf16.mxu0 %v5407_v58  ;;  %v5466_v57 = vld [vmem:[%s6973_s2 + $0x388] sm:$0xff]   ;;  %v5467_v58 = vld [vmem:[%s6973_s2 + $0x350] sm:$0xff]  }
  0x36   :  { %4825 = vmatprep.subr.bf16.mxu1 %v5408_v59  ;;  %v5468_v59 = vld [vmem:[%s6973_s2 + $0x3d0] sm:$0xff]  }
  0x38   :  { %4804 = vmatpush3.bf16.msra.mxu0 %v5409_v60  ;;  %v5469_v60 = vld [vmem:[%s6973_s2 + $0x310] sm:$0xff]  }
  0x39   :  { %4826 = vmatpush3.bf16.msra.mxu1 %v5410_v61  ;;  %4805 = vmatprep.subr.bf16.mxu0 %v5411_v62  ;;  %v5470_v61 = vld [vmem:[%s6973_s2 + $0x390] sm:$0xff]   ;;  %v5471_v62 = vld [vmem:[%s6973_s2 + $0x358] sm:$0xff]  }
  0x3a   :  { %4827 = vmatprep.subr.bf16.mxu1 %v5412_v63  ;;  %v5472_v63 = vld [vmem:[%s6973_s2 + $0x3d8] sm:$0xff]  }
  0x3c   :  { %4806 = vmatpush3.bf16.msra.mxu0 %v5413_v0  ;;  %v5473_v0 = vld [vmem:[%s6973_s2 + $0x318] sm:$0xff]  }
  0x3d   :  { %4828 = vmatpush3.bf16.msra.mxu1 %v5414_v1  ;;  %4807 = vmatprep.subr.bf16.mxu0 %v5415_v2  ;;  %v5474_v1 = vld [vmem:[%s6973_s2 + $0x398] sm:$0xff]   ;;  %v5475_v2 = vld [vmem:[%s6973_s2 + $0x360] sm:$0xff]  }
  0x3e   :  { %4829 = vmatprep.subr.bf16.mxu1 %v5416_v3  ;;  %v5476_v3 = vld [vmem:[%s6973_s2 + $0x3e0] sm:$0xff]  }
  0x40   :  { %4808 = vmatpush3.bf16.msra.mxu0 %v5417_v4  ;;  %v5477_v4 = vld [vmem:[%s6973_s2 + $0x320] sm:$0xff]  }
  0x41   :  { %4830 = vmatpush3.bf16.msra.mxu1 %v5418_v5  ;;  %4837 = vmatprep.subr.bf16.mxu0 %v5423_v12  ;;  %v5478_v5 = vld [vmem:[%s6973_s2 + $0x3a0] sm:$0xff]   ;;  %v5485_v12 = vld [vmem:[%s6973_s2 + $0x330] sm:$0xff]  }
  0x42   :  { %4859 = vmatprep.subr.bf16.mxu1 %v5424_v13  ;;  %v5486_v13 = vld [vmem:[%s6973_s2 + $0x3b0] sm:$0xff]  }
  0x43   :  { %1436 = vmatmul.mubr.bf16.vlgmr.msra.gmra.mrb[4].mxu0 %v4010_v7  ;;  %v5480_v7 = vld [vmem:[%s6973_s2 + $0x3e8] sm:$0xff]  }
  0x44   :  { %1476 = vmatmul.mubr.bf16.vlgmr.msra.gmra.mrb[4].mxu1 %v4012_v10  ;;  %4838 = vmatpush3.bf16.msra.mxu0 %v5425_v14  ;;  %v5483_v10 = vld [vmem:[%s6973_s2 + $0x370] sm:$0xff]   ;;  %v5487_v14 = vld [vmem:[%s6973_s2 + $0x378] sm:$0xff]  }
  0x45   :  { %4860 = vmatpush3.bf16.msra.mxu1 %v5426_v15  ;;  %4839 = vmatprep.subr.bf16.mxu0 %v5427_v16  ;;  %v5488_v15 = vld [vmem:[%s6973_s2 + $0x3f8] sm:$0xff]  }
  0x46   :  { %4861 = vmatprep.subr.bf16.mxu1 %v5428_v17  ;;  %1515 = vmatprep.mubr.bf16.mxu0 %v4015_v47  ;;  %v5489_v16 = vld [vmem:[%s6973_s2 + $0x338] sm:$0xff]   ;;  %v4023_v47 = vcombine.high %v38_v45, %v38_v45 }
  0x47   :  { %1555 = vmatprep.mubr.bf16.mxu1 %v4017_v49  ;;  %v5490_v17 = vld [vmem:[%s6973_s2 + $0x3b8] sm:$0xff]  }
  0x48   :  { %4840 = vmatpush3.bf16.msra.mxu0 %v5429_v18  ;;  %v36_v18 = vld [vmem:[%s6974_s0 + $0x30] sm:$0xff]  ;;  %v5517_v49 = vld [vmem:[%s6973_s2 + $0x438] sm:$0xff]  }
  0x49   :  { %4862 = vmatpush3.bf16.msra.mxu1 %v5430_v19  ;;  %4841 = vmatprep.subr.bf16.mxu0 %v5431_v20  ;;  %v37_v19 = vld [vmem:[%s6974_s0 + $0x38] sm:$0xff]  ;;  %v4018_v20 = vcombine.low %v36_v18, %v36_v18 }
  0x4a   :  { %4863 = vmatprep.subr.bf16.mxu1 %v5432_v21  ;;  %v4019_v21 = vcombine.high %v36_v18, %v36_v18  ;;  %v1723_v18 = vld [vmem:[%s6975_s1] sm:$0xff] }
  0x4c   :  { %4842 = vmatpush3.bf16.msra.mxu0 %v5433_v22  ;;  %v4020_v22 = vcombine.low %v37_v19, %v37_v19 }
  0x4d   :  { %4864 = vmatpush3.bf16.msra.mxu1 %v5434_v23  ;;  %4843 = vmatprep.subr.bf16.mxu0 %v5435_v24  ;;  %v5495_v23 = vld [vmem:[%s6973_s2 + $0x440] sm:$0xff]   ;;  %v4021_v24 = vcombine.high %v37_v19, %v37_v19  ;;  %v4482_v19 = vcombine.high %v1723_v18, %v1723_v18 }
  0x4e   :  { %4865 = vmatprep.subr.bf16.mxu1 %v5436_v25  ;;  %v5733_v25 = vmov 0.0  }
  0x50   :  { %4844 = vmatpush3.bf16.msra.mxu0 %v5437_v26  ;;  %v5496_v26 = vld [vmem:[%s6973_s2 + $0x400] sm:$0xff]  }
  0x51   :  { %4866 = vmatpush3.bf16.msra.mxu1 %v5438_v27  ;;  %4845 = vmatprep.subr.bf16.mxu0 %v5439_v28  ;;  %v5497_v27 = vld [vmem:[%s6973_s2 + $0x480] sm:$0xff]   ;;  %v5498_v28 = vld [vmem:[%s6973_s2 + $0x448] sm:$0xff]  }
  0x52   :  { %4867 = vmatprep.subr.bf16.mxu1 %v5440_v29  ;;  %v5499_v29 = vld [vmem:[%s6973_s2 + $0x408] sm:$0xff]  }
  0x54   :  { %4846 = vmatpush3.bf16.msra.mxu0 %v5441_v30  ;;  %v5500_v30 = vld [vmem:[%s6973_s2 + $0x488] sm:$0xff]  }
  0x55   :  { %4868 = vmatpush3.bf16.msra.mxu1 %v5442_v31  ;;  %4847 = vmatprep.subr.bf16.mxu0 %v5443_v32  ;;  %v5501_v31 = vld [vmem:[%s6973_s2 + $0x450] sm:$0xff]  }
  0x56   :  { %4869 = vmatprep.subr.bf16.mxu1 %v5444_v33  ;;  %v5502_v32 = vld [vmem:[%s6973_s2 + $0x410] sm:$0xff]  }
  0x57   :  { %v5503_v33 = vld [vmem:[%s6973_s2 + $0x490] sm:$0xff]  }
  0x58   :  { %4848 = vmatpush3.bf16.msra.mxu0 %v5445_v34  ;;  %v5504_v34 = vld [vmem:[%s6973_s2 + $0x458] sm:$0xff]  }
  0x59   :  { %4870 = vmatpush3.bf16.msra.mxu1 %v5446_v35  ;;  %4849 = vmatprep.subr.bf16.mxu0 %v5447_v36  ;;  %v5505_v35 = vld [vmem:[%s6973_s2 + $0x418] sm:$0xff]  }
  0x5a   :  { %4871 = vmatprep.subr.bf16.mxu1 %v5448_v37  ;;  %v5506_v36 = vld [vmem:[%s6973_s2 + $0x498] sm:$0xff]   ;;  %v5507_v37 = vld [vmem:[%s6973_s2 + $0x460] sm:$0xff]  }
  0x5c   :  { %4850 = vmatpush3.bf16.msra.mxu0 %v5449_v38  ;;  %v5508_v38 = vld [vmem:[%s6973_s2 + $0x420] sm:$0xff]  }
  0x5d   :  { %4872 = vmatpush3.bf16.msra.mxu1 %v5450_v39  ;;  %4851 = vmatprep.subr.bf16.mxu0 %v5451_v40  ;;  %v5509_v39 = vld [vmem:[%s6973_s2 + $0x4a0] sm:$0xff]   ;;  %v5510_v40 = vld [vmem:[%s6973_s2 + $0x468] sm:$0xff]  }
  0x5e   :  { %4873 = vmatprep.subr.bf16.mxu1 %v5452_v41  ;;  %v5511_v41 = vld [vmem:[%s6973_s2 + $0x428] sm:$0xff]  }
  0x60   :  { %4852 = vmatpush3.bf16.msra.mxu0 %v5453_v42  ;;  %v5512_v42 = vld [vmem:[%s6973_s2 + $0x4a8] sm:$0xff]  }
  0x61   :  { %4874 = vmatpush3.bf16.msra.mxu1 %v5454_v43  ;;  %4881 = vmatprep.subr.bf16.mxu0 %v5459_v50  ;;  %v5513_v43 = vld [vmem:[%s6973_s2 + $0x470] sm:$0xff]   ;;  %v5518_v50 = vld [vmem:[%s6973_s2 + $0x4b8] sm:$0xff]  }
  0x62   :  { %4903 = vmatprep.subr.bf16.mxu1 %v5460_v51  ;;  %v5521_v51 = vld [vmem:[%s6973_s2 + $0x500] sm:$0xff]  }
  0x63   :  { %1516 = vmatmul.mubr.bf16.vlgmr.msra.gmra.mrb[8].mxu0 %v4014_v46  ;;  %v5515_v46 = vld [vmem:[%s6973_s2 + $0x4b0] sm:$0xff]  }
  0x64   :  { %1556 = vmatmul.mubr.bf16.vlgmr.msra.gmra.mrb[8].mxu1 %v4016_v48  ;;  %4882 = vmatpush3.bf16.msra.mxu0 %v5461_v52  ;;  %v5516_v48 = vld [vmem:[%s6973_s2 + $0x478] sm:$0xff]   ;;  %v5522_v52 = vld [vmem:[%s6973_s2 + $0x580] sm:$0xff]  }
  0x65   :  { %4904 = vmatpush3.bf16.msra.mxu1 %v5462_v53  ;;  %4883 = vmatprep.subr.bf16.mxu0 %v5463_v54  ;;  %v5523_v53 = vld [vmem:[%s6974_s0 + $0x48] ss:$0 sps:$4 sm:$0xff]   ;;  %v5524_v54 = vld [vmem:[%s6973_s2 + $0x4c0] sm:$0xff]  }
  0x66   :  { %4905 = vmatprep.subr.bf16.mxu1 %v5464_v55  ;;  %1595 = vmatprep.mubr.bf16.mxu0 %v4019_v21  ;;  %v4022_v55 = vcombine.low %v38_v45, %v38_v45  ;;  %v5551_v21 = vld [vmem:[%s6973_s2 + $0x5b8] sm:$0xff]   ;;  %v5576_v45 = vld [vmem:[%s6973_s2 + $0x6a0] sm:$0xff]  }
  0x67   :  { %1635 = vmatprep.mubr.bf16.mxu1 %v4021_v24  ;;  %v5553_v24 = vld [vmem:[%s6973_s2 + $0x578] sm:$0xff]  }
  0x68   :  { %4884 = vmatpush3.bf16.msra.mxu0 %v5465_v56  ;;  %v5525_v56 = vld [vmem:[%s6973_s2 + $0x540] sm:$0xff]  }
  0x69   :  { %4906 = vmatpush3.bf16.msra.mxu1 %v5466_v57  ;;  %4885 = vmatprep.subr.bf16.mxu0 %v5467_v58  ;;  %v5526_v57 = vld [vmem:[%s6973_s2 + $0x508] sm:$0xff]  }
  0x6a   :  { %4907 = vmatprep.subr.bf16.mxu1 %v5468_v59  ;;  %v5527_v58 = vld [vmem:[%s6973_s2 + $0x588] sm:$0xff]  }
  0x6b   :  { %v5528_v59 = vld [vmem:[%s6973_s2 + $0x4c8] sm:$0xff]  }
  0x6c   :  { %4886 = vmatpush3.bf16.msra.mxu0 %v5469_v60  ;;  %v5529_v60 = vld [vmem:[%s6973_s2 + $0x548] sm:$0xff]  }
  0x6d   :  { %4908 = vmatpush3.bf16.msra.mxu1 %v5470_v61  ;;  %4887 = vmatprep.subr.bf16.mxu0 %v5471_v62  ;;  %v5530_v61 = vld [vmem:[%s6973_s2 + $0x510] sm:$0xff]  }
  0x6e   :  { %4909 = vmatprep.subr.bf16.mxu1 %v5472_v63  ;;  %v5531_v62 = vld [vmem:[%s6973_s2 + $0x590] sm:$0xff]  }
  0x6f   :  { %v5532_v63 = vld [vmem:[%s6973_s2 + $0x4d0] sm:$0xff]  }
  0x70   :  { %4888 = vmatpush3.bf16.msra.mxu0 %v5473_v0  ;;  %v5533_v0 = vld [vmem:[%s6973_s2 + $0x550] sm:$0xff]  }
  0x71   :  { %4910 = vmatpush3.bf16.msra.mxu1 %v5474_v1  ;;  %4889 = vmatprep.subr.bf16.mxu0 %v5475_v2  ;;  %v5534_v1 = vld [vmem:[%s6973_s2 + $0x518] sm:$0xff]  }
  0x72   :  { %4911 = vmatprep.subr.bf16.mxu1 %v5476_v3  ;;  %v5535_v2 = vld [vmem:[%s6973_s2 + $0x598] sm:$0xff]  }
  0x73   :  { %v5536_v3 = vld [vmem:[%s6973_s2 + $0x4d8] sm:$0xff]  }
  0x74   :  { %4890 = vmatpush3.bf16.msra.mxu0 %v5477_v4  ;;  %v5537_v4 = vld [vmem:[%s6973_s2 + $0x558] sm:$0xff]  }
  0x75   :  { %4912 = vmatpush3.bf16.msra.mxu1 %v5478_v5  ;;  %4891 = vmatprep.subr.bf16.mxu0 %v5479_v6  ;;  %v5538_v5 = vld [vmem:[%s6973_s2 + $0x520] sm:$0xff]  }
  0x76   :  { %4913 = vmatprep.subr.bf16.mxu1 %v5480_v7  ;;  %v5539_v6 = vld [vmem:[%s6973_s2 + $0x5a0] sm:$0xff]  }
  0x77   :  { %v5540_v7 = vld [vmem:[%s6973_s2 + $0x4e0] sm:$0xff]  }
  0x78   :  { %4892 = vmatpush3.bf16.msra.mxu0 %v5481_v8  ;;  %v5541_v8 = vld [vmem:[%s6973_s2 + $0x560] sm:$0xff]  }
  0x79   :  { %4914 = vmatpush3.bf16.msra.mxu1 %v5482_v9  ;;  %4893 = vmatprep.subr.bf16.mxu0 %v5483_v10  ;;  %v5542_v9 = vld [vmem:[%s6973_s2 + $0x528] sm:$0xff]  }
  0x7a   :  { %4915 = vmatprep.subr.bf16.mxu1 %v5484_v11  ;;  %v5543_v10 = vld [vmem:[%s6973_s2 + $0x5a8] sm:$0xff]  }
  0x7b   :  { %v5544_v11 = vld [vmem:[%s6973_s2 + $0x4e8] sm:$0xff]  }
  0x7c   :  { %4894 = vmatpush3.bf16.msra.mxu0 %v5485_v12  ;;  %v5545_v12 = vld [vmem:[%s6973_s2 + $0x568] sm:$0xff]  }
  0x7d   :  { %4916 = vmatpush3.bf16.msra.mxu1 %v5486_v13  ;;  %4895 = vmatprep.subr.bf16.mxu0 %v5487_v14  ;;  %v5546_v13 = vld [vmem:[%s6973_s2 + $0x530] sm:$0xff]  }
  0x7e   :  { %4917 = vmatprep.subr.bf16.mxu1 %v5488_v15  ;;  %v5547_v14 = vld [vmem:[%s6973_s2 + $0x5b0] sm:$0xff]  }
  0x7f   :  { %v5548_v15 = vld [vmem:[%s6973_s2 + $0x4f0] sm:$0xff]  }
  0x80   :  { %4896 = vmatpush3.bf16.msra.mxu0 %v5489_v16  ;;  %v5549_v16 = vld [vmem:[%s6973_s2 + $0x570] sm:$0xff]  }
  0x81   :  { %4918 = vmatpush3.bf16.msra.mxu1 %v5490_v17  ;;  %4925 = vmatprep.subr.bf16.mxu0 %v5495_v23  ;;  %v5550_v17 = vld [vmem:[%s6973_s2 + $0x538] sm:$0xff]  }
  0x82   :  { %5208 = vmatprep.subr.bf16.mxu1 %v5733_v25  ;;  %v5552_v23 = vld [vmem:[%s6973_s2 + $0x4f8] sm:$0xff]  }
  0x83   :  { %1596 = vmatmul.mubr.bf16.vlgmr.msra.gmra.mrb[12].mxu0 %v4018_v20  ;;  %v1724_v20 = vld [vmem:[%s6975_s1 + $0x8] sm:$0xff] }
  0x84   :  { %1636 = vmatmul.mubr.bf16.vlgmr.msra.gmra.mrb[12].mxu1 %v4020_v22  ;;  %4926 = vmatpush3.bf16.msra.mxu0 %v5496_v26  ;;  %v4484_v22 = vcombine.high %v1724_v20, %v1724_v20  ;;  %v5558_v26 = vld [vmem:[%s6973_s2 + $0x600] sm:$0xff]  }
  0x85   :  { %5209 = vmatpush3.bf16.msra.mxu1 %v5497_v27  ;;  %4927 = vmatprep.subr.bf16.mxu0 %v5498_v28  ;;  %v5560_v27 = vld [vmem:[%s6973_s2 + $0x680] sm:$0xff]   ;;  %v4481_v28 = vcombine.low %v1723_v18, %v1723_v18 }
  0x86   :  { %5210 = vmatprep.subr.bf16.mxu1 %v5733_v25  ;;  %5224 = vmatprep.mubr.msk.bf16.mxu1 %vm5734_vm0, %v5733_v25  ;;  %v5610_v18 = vld [vmem:[%s6973_s2 + $0x720] sm:$0xff]  }
  0x87   :  { %1675 = vmatprep.mubr.bf16.mxu0 %v4023_v47  ;;  %v5577_v47 = vld [vmem:[%s6973_s2 + $0x660] sm:$0xff]  }
  0x88   :  { %4928 = vmatpush3.bf16.msra.mxu0 %v5499_v29  ;;  %v5559_v29 = vld [vmem:[%s6973_s2 + $0x5c0] sm:$0xff]  }
  0x89   :  { %5211 = vmatpush3.bf16.msra.mxu1 %v5500_v30  ;;  %4929 = vmatprep.subr.bf16.mxu0 %v5501_v31  ;;  %v4483_v30 = vcombine.low %v1724_v20, %v1724_v20  ;;  %v5561_v31 = vld [vmem:[%s6973_s2 + $0x640] sm:$0xff]  }
  0x8a   :  { %5212 = vmatprep.subr.bf16.mxu1 %v5733_v25  ;;  %v5611_v20 = vld [vmem:[%s6973_s2 + $0x6e0] sm:$0xff]  }
  0x8c   :  { %4930 = vmatpush3.bf16.msra.mxu0 %v5502_v32  ;;  %v5562_v32 = vld [vmem:[%s6973_s2 + $0x608] sm:$0xff]  }
  0x8d   :  { %5213 = vmatpush3.bf16.msra.mxu1 %v5503_v33  ;;  %4931 = vmatprep.subr.bf16.mxu0 %v5504_v34  ;;  %v5564_v33 = vld [vmem:[%s6973_s2 + $0x688] sm:$0xff]  }
  0x8e   :  { %5214 = vmatprep.subr.bf16.mxu1 %v5733_v25  ;;  %v5563_v34 = vld [vmem:[%s6973_s2 + $0x5c8] sm:$0xff]  }
  0x90   :  { %4932 = vmatpush3.bf16.msra.mxu0 %v5505_v35  ;;  %v5565_v35 = vld [vmem:[%s6973_s2 + $0x648] sm:$0xff]  }
  0x91   :  { %5215 = vmatpush3.bf16.msra.mxu1 %v5506_v36  ;;  %4933 = vmatprep.subr.bf16.mxu0 %v5507_v37  ;;  %v5566_v36 = vld [vmem:[%s6973_s2 + $0x610] sm:$0xff]  }
  0x92   :  { %5216 = vmatprep.subr.bf16.mxu1 %v5733_v25  ;;  %v5568_v37 = vld [vmem:[%s6973_s2 + $0x690] sm:$0xff]  }
  0x94   :  { %4934 = vmatpush3.bf16.msra.mxu0 %v5508_v38  ;;  %v5567_v38 = vld [vmem:[%s6973_s2 + $0x5d0] sm:$0xff]  }
  0x95   :  { %5217 = vmatpush3.bf16.msra.mxu1 %v5509_v39  ;;  %4935 = vmatprep.subr.bf16.mxu0 %v5510_v40  ;;  %v5569_v39 = vld [vmem:[%s6973_s2 + $0x650] sm:$0xff]   ;;  %v5570_v40 = vld [vmem:[%s6973_s2 + $0x618] sm:$0xff]  }
  0x96   :  { %5218 = vmatprep.subr.bf16.mxu1 %v5733_v25 }
  0x98   :  { %4936 = vmatpush3.bf16.msra.mxu0 %v5511_v41  ;;  %v5572_v41 = vld [vmem:[%s6973_s2 + $0x698] sm:$0xff]  }
  0x99   :  { %5219 = vmatpush3.bf16.msra.mxu1 %v5512_v42  ;;  %4937 = vmatprep.subr.bf16.mxu0 %v5513_v43  ;;  %v5571_v42 = vld [vmem:[%s6973_s2 + $0x5d8] sm:$0xff]  }
  0x9a   :  { %5220 = vmatprep.subr.bf16.mxu1 %v5733_v25  ;;  %v5573_v43 = vld [vmem:[%s6973_s2 + $0x658] sm:$0xff]  }
  0x9c   :  { %4938 = vmatpush3.bf16.msra.mxu0 %v5514_v44  ;;  %v5574_v44 = vld [vmem:[%s6973_s2 + $0x620] sm:$0xff]  }
  0x9d   :  { %5221 = vmatpush3.bf16.msra.mxu1 %v5515_v46  ;;  %4939 = vmatprep.subr.bf16.mxu0 %v5516_v48  ;;  %v5575_v46 = vld [vmem:[%s6973_s2 + $0x5e0] sm:$0xff]   ;;  %v5578_v48 = vld [vmem:[%s6973_s2 + $0x628] sm:$0xff]  }
  0x9e   :  { %5222 = vmatprep.subr.bf16.mxu1 %v5733_v25 }
  0xa0   :  { %4940 = vmatpush3.bf16.msra.mxu0 %v5517_v49  ;;  %v5580_v49 = vld [vmem:[%s6973_s2 + $0x6a8] sm:$0xff]  }
  0xa1   :  { %5223 = vmatpush3.bf16.msra.mxu1 %v5518_v50  ;;  %4956 = vmatprep.subr.bf16.mxu0 %v5521_v51  ;;  %v5579_v50 = vld [vmem:[%s6973_s2 + $0x5e8] sm:$0xff]  }
  0xa2   :  { %4978 = vmatprep.subr.bf16.mxu1 %v5522_v52  ;;  %v5581_v51 = vld [vmem:[%s6973_s2 + $0x668] sm:$0xff]   ;;  %v5582_v52 = vld [vmem:[%s6973_s2 + $0x630] sm:$0xff]  }
  0xa3   :  { %1676 = vmatmul.mubr.bf16.vlgmr.msra.gmra.mrb[16].mxu0 %v4022_v55  ;;  %v5585_v55 = vld [vmem:[%s6973_s2 + $0x670] sm:$0xff]  }
  0xa4   :  { %5225 = vmatmul.mubr.bf16.vlgmr.msra.gmra.mrb[16].mxu1 %v5523_v53  ;;  %4957 = vmatpush3.bf16.msra.mxu0 %v5524_v54  ;;  %v5584_v53 = vld [vmem:[%s6973_s2 + $0x6b0] sm:$0xff]  }
  0xa5   :  { %4979 = vmatpush3.bf16.msra.mxu1 %v5525_v56  ;;  %4958 = vmatprep.subr.bf16.mxu0 %v5526_v57  ;;  %v5583_v54 = vld [vmem:[%s6973_s2 + $0x5f0] sm:$0xff]   ;;  %v5586_v57 = vld [vmem:[%s6973_s2 + $0x638] sm:$0xff]  }
  0xa6   :  { %4980 = vmatprep.subr.bf16.mxu1 %v5527_v58  ;;  %3049 = vmatprep.mubr.bf16.mxu0 %v4482_v19  ;;  %v1725_v56 = vld [vmem:[%s6975_s1 + $0x10] sm:$0xff]  ;;  %v5612_v19 = vld [vmem:[%s6973_s2 + $0x7a0] sm:$0xff]  }
  0xa7   :  { %3089 = vmatprep.mubr.bf16.mxu1 %v4484_v22  ;;  %v4486_v58 = vcombine.high %v1725_v56, %v1725_v56  ;;  %v5614_v22 = vld [vmem:[%s6973_s2 + $0x728] sm:$0xff]  }
  0xa8   :  { %4959 = vmatpush3.bf16.msra.mxu0 %v5528_v59  ;;  %v5588_v59 = vld [vmem:[%s6973_s2 + $0x6b8] sm:$0xff]  }
  0xa9   :  { %4981 = vmatpush3.bf16.msra.mxu1 %v5529_v60  ;;  %4960 = vmatprep.subr.bf16.mxu0 %v5530_v61  ;;  %v1726_v60 = vld [vmem:[%s6975_s1 + $0x18] sm:$0xff] }
  0xaa   :  { %4982 = vmatprep.subr.bf16.mxu1 %v5531_v62  ;;  %v5587_v61 = vld [vmem:[%s6973_s2 + $0x5f8] sm:$0xff]   ;;  %v4488_v62 = vcombine.high %v1726_v60, %v1726_v60 }
  0xac   :  { %4961 = vmatpush3.bf16.msra.mxu0 %v5532_v63  ;;  %v5591_v63 = vld [vmem:[%s6973_s2 + $0x678] sm:$0xff]  }
  0xad   :  { %4983 = vmatpush3.bf16.msra.mxu1 %v5533_v0  ;;  %4962 = vmatprep.subr.bf16.mxu0 %v5534_v1  ;;  %v5592_v0 = vld [vmem:[%s6973_s2 + $0x700] sm:$0xff]  }
  0xae   :  { %4984 = vmatprep.subr.bf16.mxu1 %v5535_v2  ;;  %v5596_v1 = vld [vmem:[%s6973_s2 + $0x780] sm:$0xff]   ;;  %v4485_v2 = vcombine.low %v1725_v56, %v1725_v56  ;;  %v5634_v56 = vld [vmem:[%s6973_s2 + $0x808] sm:$0xff]  }
  0xb0   :  { %4963 = vmatpush3.bf16.msra.mxu0 %v5536_v3  ;;  %v5595_v3 = vld [vmem:[%s6973_s2 + $0x6c0] sm:$0xff]  }
  0xb1   :  { %4985 = vmatpush3.bf16.msra.mxu1 %v5537_v4  ;;  %4964 = vmatprep.subr.bf16.mxu0 %v5538_v5  ;;  %v4487_v4 = vcombine.low %v1726_v60, %v1726_v60  ;;  %v5597_v5 = vld [vmem:[%s6973_s2 + $0x740] sm:$0xff]   ;;  %v5638_v60 = vld [vmem:[%s6973_s2 + $0x810] sm:$0xff]  }
  0xb2   :  { %4986 = vmatprep.subr.bf16.mxu1 %v5539_v6  ;;  %v5598_v6 = vld [vmem:[%s6973_s2 + $0x708] sm:$0xff]  }
  0xb4   :  { %4965 = vmatpush3.bf16.msra.mxu0 %v5540_v7  ;;  %v5600_v7 = vld [vmem:[%s6973_s2 + $0x788] sm:$0xff]  }
  0xb5   :  { %4987 = vmatpush3.bf16.msra.mxu1 %v5541_v8  ;;  %4966 = vmatprep.subr.bf16.mxu0 %v5542_v9  ;;  %v5599_v8 = vld [vmem:[%s6973_s2 + $0x6c8] sm:$0xff]  }
  0xb6   :  { %4988 = vmatprep.subr.bf16.mxu1 %v5543_v10  ;;  %v5601_v9 = vld [vmem:[%s6973_s2 + $0x748] sm:$0xff]   ;;  %v5602_v10 = vld [vmem:[%s6973_s2 + $0x710] sm:$0xff]  }
  0xb8   :  { %4967 = vmatpush3.bf16.msra.mxu0 %v5544_v11  ;;  %v5604_v11 = vld [vmem:[%s6973_s2 + $0x790] sm:$0xff]  }
  0xb9   :  { %4989 = vmatpush3.bf16.msra.mxu1 %v5545_v12  ;;  %4968 = vmatprep.subr.bf16.mxu0 %v5546_v13  ;;  %v5603_v12 = vld [vmem:[%s6973_s2 + $0x6d0] sm:$0xff]  }
  0xba   :  { %4990 = vmatprep.subr.bf16.mxu1 %v5547_v14  ;;  %v5605_v13 = vld [vmem:[%s6973_s2 + $0x750] sm:$0xff]   ;;  %v5606_v14 = vld [vmem:[%s6973_s2 + $0x718] sm:$0xff]  }
  0xbc   :  { %4969 = vmatpush3.bf16.msra.mxu0 %v5548_v15  ;;  %v5608_v15 = vld [vmem:[%s6973_s2 + $0x798] sm:$0xff]  }
  0xbd   :  { %4991 = vmatpush3.bf16.msra.mxu1 %v5549_v16  ;;  %4970 = vmatprep.subr.bf16.mxu0 %v5550_v17  ;;  %v5607_v16 = vld [vmem:[%s6973_s2 + $0x6d8] sm:$0xff]  }
  0xbe   :  { %4992 = vmatprep.subr.bf16.mxu1 %v5551_v21  ;;  %v5609_v17 = vld [vmem:[%s6973_s2 + $0x758] sm:$0xff]   ;;  %v5613_v21 = vld [vmem:[%s6973_s2 + $0x760] sm:$0xff]  }
  0xc0   :  { %4971 = vmatpush3.bf16.msra.mxu0 %v5552_v23  ;;  %v5615_v23 = vld [vmem:[%s6973_s2 + $0x6e8] sm:$0xff]  }
  0xc1   :  { %4993 = vmatpush3.bf16.msra.mxu1 %v5553_v24  ;;  %5000 = vmatprep.subr.bf16.mxu0 %v5558_v26  ;;  %v5616_v24 = vld [vmem:[%s6973_s2 + $0x7a8] sm:$0xff]  }
  0xc2   :  { %5022 = vmatprep.subr.bf16.mxu1 %v5560_v27  ;;  %v5617_v26 = vld [vmem:[%s6973_s2 + $0x768] sm:$0xff]  }
  0xc3   :  { %3050 = vmatmul.mubr.bf16.vlgmr.msra.gmra.mrb[20].mxu0 %v4481_v28 }
  0xc4   :  { %3090 = vmatmul.mubr.bf16.vlgmr.msra.gmra.mrb[20].mxu1 %v4483_v30  ;;  %5001 = vmatpush3.bf16.msra.mxu0 %v5559_v29 }
  0xc5   :  { %5023 = vmatpush3.bf16.msra.mxu1 %v5561_v31  ;;  %5002 = vmatprep.subr.bf16.mxu0 %v5562_v32  ;;  %v5618_v31 = vld [vmem:[%s6973_s2 + $0x730] sm:$0xff]  }
  0xc6   :  { %5024 = vmatprep.subr.bf16.mxu1 %v5564_v33  ;;  %3129 = vmatprep.mubr.bf16.mxu0 %v4486_v58  ;;  %v5620_v32 = vld [vmem:[%s6973_s2 + $0x7b0] sm:$0xff]   ;;  %v5635_v58 = vld [vmem:[%s6973_s2 + $0x7c8] sm:$0xff]  }
  0xc7   :  { %3169 = vmatprep.mubr.bf16.mxu1 %v4488_v62  ;;  %v5639_v62 = vld [vmem:[%s6973_s2 + $0x7d0] sm:$0xff]  }
  0xc8   :  { %5003 = vmatpush3.bf16.msra.mxu0 %v5563_v34 }
  0xc9   :  { %5025 = vmatpush3.bf16.msra.mxu1 %v5565_v35  ;;  %5004 = vmatprep.subr.bf16.mxu0 %v5566_v36 }
  0xca   :  { %5026 = vmatprep.subr.bf16.mxu1 %v5568_v37 }
  0xcc   :  { %5005 = vmatpush3.bf16.msra.mxu0 %v5567_v38 }
  0xcd   :  { %5027 = vmatpush3.bf16.msra.mxu1 %v5569_v39  ;;  %5006 = vmatprep.subr.bf16.mxu0 %v5570_v40  ;;  %v5619_v39 = vld [vmem:[%s6973_s2 + $0x6f0] sm:$0xff]  }
  0xce   :  { %5028 = vmatprep.subr.bf16.mxu1 %v5572_v41  ;;  %v5621_v40 = vld [vmem:[%s6973_s2 + $0x770] sm:$0xff]  }
  0xd0   :  { %5007 = vmatpush3.bf16.msra.mxu0 %v5571_v42  ;;  %v5622_v42 = vld [vmem:[%s6973_s2 + $0x738] sm:$0xff]  }
  0xd1   :  { %5029 = vmatpush3.bf16.msra.mxu1 %v5573_v43  ;;  %5008 = vmatprep.subr.bf16.mxu0 %v5574_v44  ;;  %v1727_v43 = vld [vmem:[%s6975_s1 + $0x20] sm:$0xff]  ;;  %v5623_v44 = vld [vmem:[%s6973_s2 + $0x6f8] sm:$0xff]  }
  0xd2   :  { %5030 = vmatprep.subr.bf16.mxu1 %v5576_v45  ;;  %v5624_v45 = vld [vmem:[%s6973_s2 + $0x7b8] sm:$0xff]  }
  0xd4   :  { %5009 = vmatpush3.bf16.msra.mxu0 %v5575_v46  ;;  %v4490_v46 = vcombine.high %v1727_v43, %v1727_v43 }
  0xd5   :  { %5031 = vmatpush3.bf16.msra.mxu1 %v5577_v47  ;;  %5010 = vmatprep.subr.bf16.mxu0 %v5578_v48  ;;  %v5627_v47 = vld [vmem:[%s6973_s2 + $0x778] sm:$0xff]   ;;  %v1728_v48 = vld [vmem:[%s6975_s1 + $0x28] sm:$0xff] }
  0xd6   :  { %5032 = vmatprep.subr.bf16.mxu1 %v5580_v49  ;;  %v5628_v49 = vld [vmem:[%s6973_s2 + $0x800] sm:$0xff]  }
  0xd8   :  { %5011 = vmatpush3.bf16.msra.mxu0 %v5579_v50  ;;  %v4492_v50 = vcombine.high %v1728_v48, %v1728_v48 }
  0xd9   :  { %5033 = vmatpush3.bf16.msra.mxu1 %v5581_v51  ;;  %5012 = vmatprep.subr.bf16.mxu0 %v5582_v52  ;;  %v5632_v51 = vld [vmem:[%s6973_s2 + $0x880] sm:$0xff]   ;;  %v4489_v52 = vcombine.low %v1727_v43, %v1727_v43  ;;  %v5670_v43 = vld [vmem:[%s6973_s2 + $0x8c8] sm:$0xff]  }
  0xda   :  { %5034 = vmatprep.subr.bf16.mxu1 %v5584_v53  ;;  %v5631_v53 = vld [vmem:[%s6973_s2 + $0x7c0] sm:$0xff]  }
  0xdc   :  { %5013 = vmatpush3.bf16.msra.mxu0 %v5583_v54  ;;  %v4491_v54 = vcombine.low %v1728_v48, %v1728_v48  ;;  %v5675_v48 = vld [vmem:[%s6973_s2 + $0x918] sm:$0xff]  }
  0xdd   :  { %5035 = vmatpush3.bf16.msra.mxu1 %v5585_v55  ;;  %5014 = vmatprep.subr.bf16.mxu0 %v5586_v57  ;;  %v5633_v55 = vld [vmem:[%s6973_s2 + $0x840] sm:$0xff]   ;;  %v5636_v57 = vld [vmem:[%s6973_s2 + $0x888] sm:$0xff]  }
  0xde   :  { %5036 = vmatprep.subr.bf16.mxu1 %v5588_v59  ;;  %v5637_v59 = vld [vmem:[%s6973_s2 + $0x848] sm:$0xff]  }
  0xe0   :  { %5015 = vmatpush3.bf16.msra.mxu0 %v5587_v61  ;;  %v5640_v61 = vld [vmem:[%s6973_s2 + $0x890] sm:$0xff]  }
  0xe1   :  { %5037 = vmatpush3.bf16.msra.mxu1 %v5591_v63  ;;  %5044 = vmatprep.subr.bf16.mxu0 %v5592_v0  ;;  %v5641_v63 = vld [vmem:[%s6973_s2 + $0x850] sm:$0xff]   ;;  %v5642_v0 = vld [vmem:[%s6973_s2 + $0x818] sm:$0xff]  }
  0xe2   :  { %5066 = vmatprep.subr.bf16.mxu1 %v5596_v1  ;;  %v5644_v1 = vld [vmem:[%s6973_s2 + $0x898] sm:$0xff]  }
  0xe3   :  { %3130 = vmatmul.mubr.bf16.vlgmr.msra.gmra.mrb[24].mxu0 %v4485_v2  ;;  %v5643_v2 = vld [vmem:[%s6973_s2 + $0x7d8] sm:$0xff]  }
  0xe4   :  { %5045 = vmatpush3.bf16.msra.mxu0 %v5595_v3  ;;  %3170 = vmatmul.mubr.bf16.vlgmr.msra.gmra.mrb[24].mxu1 %v4487_v4  ;;  %v5645_v3 = vld [vmem:[%s6973_s2 + $0x858] sm:$0xff]   ;;  %v5646_v4 = vld [vmem:[%s6973_s2 + $0x820] sm:$0xff]  }
  0xe5   :  { %5067 = vmatpush3.bf16.msra.mxu1 %v5597_v5  ;;  %5046 = vmatprep.subr.bf16.mxu0 %v5598_v6  ;;  %v5648_v5 = vld [vmem:[%s6973_s2 + $0x8a0] sm:$0xff]  }
  0xe6   :  { %5068 = vmatprep.subr.bf16.mxu1 %v5600_v7  ;;  %3209 = vmatprep.mubr.bf16.mxu0 %v4490_v46  ;;  %v5647_v6 = vld [vmem:[%s6973_s2 + $0x7e0] sm:$0xff]   ;;  %v5673_v46 = vld [vmem:[%s6973_s2 + $0x8d0] sm:$0xff]  }
  0xe7   :  { %3249 = vmatprep.mubr.bf16.mxu1 %v4492_v50  ;;  %v5649_v7 = vld [vmem:[%s6973_s2 + $0x860] sm:$0xff]   ;;  %v5677_v50 = vld [vmem:[%s6973_s2 + $0x958] sm:$0xff]  }
  0xe8   :  { %5047 = vmatpush3.bf16.msra.mxu0 %v5599_v8  ;;  %v5650_v8 = vld [vmem:[%s6973_s2 + $0x828] sm:$0xff]  }
  0xe9   :  { %5069 = vmatpush3.bf16.msra.mxu1 %v5601_v9  ;;  %5048 = vmatprep.subr.bf16.mxu0 %v5602_v10  ;;  %v5652_v9 = vld [vmem:[%s6973_s2 + $0x8a8] sm:$0xff]  }
  0xea   :  { %5070 = vmatprep.subr.bf16.mxu1 %v5604_v11  ;;  %v5651_v10 = vld [vmem:[%s6973_s2 + $0x7e8] sm:$0xff]  }
  0xeb   :  { %v5653_v11 = vld [vmem:[%s6973_s2 + $0x868] sm:$0xff]  }
  0xec   :  { %5049 = vmatpush3.bf16.msra.mxu0 %v5603_v12 }
  0xed   :  { %5071 = vmatpush3.bf16.msra.mxu1 %v5605_v13  ;;  %5050 = vmatprep.subr.bf16.mxu0 %v5606_v14  ;;  %v5654_v13 = vld [vmem:[%s6973_s2 + $0x830] sm:$0xff]  }
  0xee   :  { %5072 = vmatprep.subr.bf16.mxu1 %v5608_v15 }
  0xf0   :  { %5051 = vmatpush3.bf16.msra.mxu0 %v5607_v16  ;;  %v5655_v16 = vld [vmem:[%s6973_s2 + $0x7f0] sm:$0xff]  }
  0xf1   :  { %5073 = vmatpush3.bf16.msra.mxu1 %v5609_v17  ;;  %5052 = vmatprep.subr.bf16.mxu0 %v5610_v18  ;;  %v5656_v17 = vld [vmem:[%s6973_s2 + $0x8b0] sm:$0xff]  }
  0xf2   :  { %5074 = vmatprep.subr.bf16.mxu1 %v5612_v19 }
  0xf4   :  { %5053 = vmatpush3.bf16.msra.mxu0 %v5611_v20 }
  0xf5   :  { %5075 = vmatpush3.bf16.msra.mxu1 %v5613_v21  ;;  %5054 = vmatprep.subr.bf16.mxu0 %v5614_v22 }
  0xf6   :  { %v4765_v27 = vpop.f32.mrb[0].mxu0  ;;  %5076 = vmatprep.subr.bf16.mxu1 %v5616_v24  ;;  %v5657_v24 = vld [vmem:[%s6973_s2 + $0x870] sm:$0xff]  }
  0xf7   :  { %v4787_v28 = vpop.f32.mrb[0].mxu1  ;;  %v4766_v29 = vpop.f32.mrb[1].mxu0 }
  0xf8   :  { %v4788_v30 = vpop.f32.mrb[1].mxu1  ;;  %v4767_v33 = vadd.f32 %v4766_v29, %v4765_v27  ;;  %v4768_v35 = vpop.f32.mrb[2].mxu0  ;;  %5055 = vmatpush3.bf16.msra.mxu0 %v5615_v23  ;;  %v5660_v29 = vld [vmem:[%s6973_s2 + $0x8b8] sm:$0xff]  }
  0xf9   :  { %v4789_v34 = vadd.f32 %v4788_v30, %v4787_v28  ;;  %v4790_v36 = vpop.f32.mrb[2].mxu1  ;;  %v4769_v37 = vpop.f32.mrb[3].mxu0  ;;  %5077 = vmatpush3.bf16.msra.mxu1 %v5617_v26  ;;  %5056 = vmatprep.subr.bf16.mxu0 %v5618_v31  ;;  %v5658_v26 = vld [vmem:[%s6973_s2 + $0x838] sm:$0xff]   ;;  %v1729_v31 = vld [vmem:[%s6975_s1 + $0x30] sm:$0xff]  ;;  %v5664_v35 = vld [vmem:[%s6973_s2 + $0x900] sm:$0xff]  }
  0xfa   :  { %v4791_v38 = vpop.f32.mrb[3].mxu1  ;;  %5078 = vmatprep.subr.bf16.mxu1 %v5620_v32  ;;  %v5659_v30 = vld [vmem:[%s6973_s2 + $0x7f8] sm:$0xff]  }
  0xfb   :  { %v6565_v41 = vadd.f32 %v4789_v34, %v4767_v33  ;;  %v4494_v33 = vcombine.high %v1729_v31, %v1729_v31  ;;  %v5663_v34 = vld [vmem:[%s6973_s2 + $0x878] sm:$0xff]   ;;  %v4493_v38 = vcombine.low %v1729_v31, %v1729_v31 }
  0xfc   :  { %5057 = vmatpush3.bf16.msra.mxu0 %v5619_v39  ;;  %v1730_v36 = vld [vmem:[%s6975_s1 + $0x38] sm:$0xff]  ;;  %v5667_v39 = vld [vmem:[%s6973_s2 + $0x8c0] sm:$0xff]  }
  0xfd   :  { %5079 = vmatpush3.bf16.msra.mxu1 %v5621_v40  ;;  %5058 = vmatprep.subr.bf16.mxu0 %v5622_v42  ;;  %v4496_v37 = vcombine.high %v1730_v36, %v1730_v36  ;;  %v4495_v40 = vcombine.low %v1730_v36, %v1730_v36  ;;  %v5669_v42 = vld [vmem:[%s6973_s2 + $0x908] sm:$0xff]  }
  0xfe   :  { %5080 = vmatprep.subr.bf16.mxu1 %v5624_v45  ;;  %v5672_v45 = vld [vmem:[%s6973_s2 + $0x910] sm:$0xff]  }
 0x100   :  { %5059 = vmatpush3.bf16.msra.mxu0 %v5623_v44  ;;  %v5671_v44 = vld [vmem:[%s6973_s2 + $0x948] sm:$0xff]  }
 0x101   :  { %5081 = vmatpush3.bf16.msra.mxu1 %v5627_v47  ;;  %5088 = vmatprep.subr.bf16.mxu0 %v5628_v49  ;;  %v5674_v47 = vld [vmem:[%s6973_s2 + $0x950] sm:$0xff]   ;;  %v5676_v49 = vld [vmem:[%s6973_s2 + $0x8d8] sm:$0xff]  }
 0x102   :  { %5110 = vmatprep.subr.bf16.mxu1 %v5632_v51  ;;  %v5678_v51 = vld [vmem:[%s6973_s2 + $0x920] sm:$0xff]  }
 0x103   :  { %3210 = vmatmul.mubr.bf16.vlgmr.msra.gmra.mrb[28].mxu0 %v4489_v52  ;;  %v5679_v52 = vld [vmem:[%s6973_s2 + $0x8e0] sm:$0xff]  }
 0x104   :  { %5089 = vmatpush3.bf16.msra.mxu0 %v5631_v53  ;;  %3250 = vmatmul.mubr.bf16.vlgmr.msra.gmra.mrb[28].mxu1 %v4491_v54  ;;  %v5680_v53 = vld [vmem:[%s6973_s2 + $0x960] sm:$0xff]   ;;  %v5681_v54 = vld [vmem:[%s6973_s2 + $0x928] sm:$0xff]  }
 0x105   :  { %5111 = vmatpush3.bf16.msra.mxu1 %v5633_v55  ;;  %5090 = vmatprep.subr.bf16.mxu0 %v5634_v56  ;;  %v1731_v55 = vld [vmem:[%s6975_s1 + $0x40] sm:$0xff]  ;;  %v5682_v56 = vld [vmem:[%s6973_s2 + $0x8e8] sm:$0xff]  }
 0x106   :  { %5112 = vmatprep.subr.bf16.mxu1 %v5636_v57  ;;  %3289 = vmatprep.mubr.bf16.mxu0 %v4494_v33  ;;  %v4498_v57 = vcombine.high %v1731_v55, %v1731_v55 }
 0x107   :  { %3329 = vmatprep.mubr.bf16.mxu1 %v4496_v37 }
 0x108   :  { %5091 = vmatpush3.bf16.msra.mxu0 %v5635_v58 }
 0x109   :  { %5113 = vmatpush3.bf16.msra.mxu1 %v5637_v59  ;;  %5092 = vmatprep.subr.bf16.mxu0 %v5638_v60  ;;  %v5683_v59 = vld [vmem:[%s6973_s2 + $0x968] sm:$0xff]   ;;  %v5684_v60 = vld [vmem:[%s6973_s2 + $0x930] sm:$0xff]  }
 0x10a   :  { %5114 = vmatprep.subr.bf16.mxu1 %v5640_v61 }
 0x10c   :  { %5093 = vmatpush3.bf16.msra.mxu0 %v5639_v62 }
 0x10d   :  { %5115 = vmatpush3.bf16.msra.mxu1 %v5641_v63  ;;  %5094 = vmatprep.subr.bf16.mxu0 %v5642_v0 }
 0x10e   :  { %5116 = vmatprep.subr.bf16.mxu1 %v5644_v1 }
 0x110   :  { %5095 = vmatpush3.bf16.msra.mxu0 %v5643_v2 }
 0x111   :  { %5117 = vmatpush3.bf16.msra.mxu1 %v5645_v3  ;;  %5096 = vmatprep.subr.bf16.mxu0 %v5646_v4 }
 0x112   :  { %5118 = vmatprep.subr.bf16.mxu1 %v5648_v5  ;;  %v5685_v5 = vld [vmem:[%s6973_s2 + $0x8f0] sm:$0xff]  }
 0x114   :  { %5097 = vmatpush3.bf16.msra.mxu0 %v5647_v6 }
 0x115   :  { %5119 = vmatpush3.bf16.msra.mxu1 %v5649_v7  ;;  %5098 = vmatprep.subr.bf16.mxu0 %v5650_v8  ;;  %v5686_v8 = vld [vmem:[%s6973_s2 + $0x970] sm:$0xff]  }
 0x116   :  { %v4809_v12 = vpop.f32.mrb[4].mxu0  ;;  %5120 = vmatprep.subr.bf16.mxu1 %v5652_v9  ;;  %v5687_v9 = vld [vmem:[%s6973_s2 + $0x938] sm:$0xff]  }
 0x117   :  { %v4810_v14 = vpop.f32.mrb[5].mxu0  ;;  %v4831_v15 = vpop.f32.mrb[4].mxu1 }
 0x118   :  { %v4811_v18 = vadd.f32 %v4810_v14, %v4809_v12  ;;  %v4812_v19 = vpop.f32.mrb[6].mxu0  ;;  %v4832_v20 = vpop.f32.mrb[5].mxu1  ;;  %5099 = vmatpush3.bf16.msra.mxu0 %v5651_v10  ;;  %v5691_v12 = vld [vmem:[%s6973_s2 + $0x978] sm:$0xff]   ;;  %v5692_v14 = vld [vmem:[%s6975_s1 + $0x48] ss:$0 sps:$4 sm:$0xff]  }
 0x119   :  { %v4813_v21 = vpop.f32.mrb[7].mxu0  ;;  %v4833_v22 = vadd.f32 %v4832_v20, %v4831_v15  ;;  %v4834_v23 = vpop.f32.mrb[6].mxu1  ;;  %5121 = vmatpush3.bf16.msra.mxu1 %v5653_v11  ;;  %5100 = vmatprep.subr.bf16.mxu0 %v5654_v13  ;;  %v5688_v11 = vld [vmem:[%s6973_s2 + $0x8f8] sm:$0xff]   ;;  %v4497_v13 = vcombine.low %v1731_v55, %v1731_v55  ;;  %v5698_v55 = vld [vmem:[%s6976_s4 + $0x28] sm:$0xff]  }
 0x11a   :  { %v1438_v27 = vadd.f32 %v4811_v18, %v6565_v41  ;;  %v4835_v28 = vpop.f32.mrb[7].mxu1  ;;  %5122 = vmatprep.subr.bf16.mxu1 %v5656_v17  ;;  %v5668_v41 = vld [vmem:[%s6973_s2 + $0x940] sm:$0xff]  }
 0x11c   :  { %v6682_v32 = vadd.f32 %v4833_v22, %v1438_v27  ;;  %5101 = vmatpush3.bf16.msra.mxu0 %v5655_v16 }
 0x11d   :  { %5123 = vmatpush3.bf16.msra.mxu1 %v5657_v24  ;;  %5102 = vmatprep.subr.bf16.mxu0 %v5658_v26 }
 0x11e   :  { %5124 = vmatprep.subr.bf16.mxu1 %v5660_v29 }
 0x120   :  { %5103 = vmatpush3.bf16.msra.mxu0 %v5659_v30 }
 0x121   :  { %5125 = vmatpush3.bf16.msra.mxu1 %v5663_v34  ;;  %5132 = vmatprep.subr.bf16.mxu0 %v5664_v35 }
 0x122   :  { %5228 = vmatprep.subr.bf16.mxu1 %v5733_v25 }
 0x123   :  { %3290 = vmatmul.mubr.bf16.vlgmr.msra.gmra.mrb[32].mxu0 %v4493_v38 }
 0x124   :  { %5133 = vmatpush3.bf16.msra.mxu0 %v5667_v39  ;;  %3330 = vmatmul.mubr.bf16.vlgmr.msra.gmra.mrb[32].mxu1 %v4495_v40 }
 0x125   :  { %5229 = vmatpush3.bf16.msra.mxu1 %v5668_v41  ;;  %5134 = vmatprep.subr.bf16.mxu0 %v5669_v42 }
 0x126   :  { %5230 = vmatprep.subr.bf16.mxu1 %v5733_v25  ;;  %5244 = vmatprep.mubr.msk.bf16.mxu1 %vm5734_vm0, %v5733_v25 }
 0x127   :  { %3369 = vmatprep.mubr.bf16.mxu0 %v4498_v57 }
 0x128   :  { %5135 = vmatpush3.bf16.msra.mxu0 %v5670_v43 }
 0x129   :  { %5231 = vmatpush3.bf16.msra.mxu1 %v5671_v44  ;;  %5136 = vmatprep.subr.bf16.mxu0 %v5672_v45 }
 0x12a   :  { %5232 = vmatprep.subr.bf16.mxu1 %v5733_v25 }
 0x12c   :  { %5137 = vmatpush3.bf16.msra.mxu0 %v5673_v46 }
 0x12d   :  { %5233 = vmatpush3.bf16.msra.mxu1 %v5674_v47  ;;  %5138 = vmatprep.subr.bf16.mxu0 %v5675_v48 }
 0x12e   :  { %5234 = vmatprep.subr.bf16.mxu1 %v5733_v25 }
 0x130   :  { %5139 = vmatpush3.bf16.msra.mxu0 %v5676_v49 }
 0x131   :  { %5235 = vmatpush3.bf16.msra.mxu1 %v5677_v50  ;;  %5140 = vmatprep.subr.bf16.mxu0 %v5678_v51  ;;  %v5693_v50 = vld [vmem:[%s6976_s4] sm:$0xff]   ;;  %v5694_v51 = vld [vmem:[%s6976_s4 + $0x8] sm:$0xff]  }
 0x132   :  { %5236 = vmatprep.subr.bf16.mxu1 %v5733_v25 }
 0x134   :  { %5141 = vmatpush3.bf16.msra.mxu0 %v5679_v52  ;;  %v5695_v52 = vld [vmem:[%s6976_s4 + $0x10] sm:$0xff]  }
 0x135   :  { %5237 = vmatpush3.bf16.msra.mxu1 %v5680_v53  ;;  %5142 = vmatprep.subr.bf16.mxu0 %v5681_v54  ;;  %v5696_v53 = vld [vmem:[%s6976_s4 + $0x18] sm:$0xff]   ;;  %v5697_v54 = vld [vmem:[%s6976_s4 + $0x20] sm:$0xff]  }
 0x136   :  { %v4853_v58 = vpop.f32.mrb[8].mxu0  ;;  %5238 = vmatprep.subr.bf16.mxu1 %v5733_v25 }
 0x137   :  { %v4854_v61 = vpop.f32.mrb[9].mxu0  ;;  %v4875_v62 = vpop.f32.mrb[8].mxu1 }
 0x138   :  { %v4855_v63 = vadd.f32 %v4854_v61, %v4853_v58  ;;  %v4856_v0 = vpop.f32.mrb[10].mxu0  ;;  %v4876_v1 = vpop.f32.mrb[9].mxu1  ;;  %5143 = vmatpush3.bf16.msra.mxu0 %v5682_v56 }
 0x139   :  { %v4857_v2 = vpop.f32.mrb[11].mxu0  ;;  %v4877_v3 = vadd.f32 %v4876_v1, %v4875_v62  ;;  %v4878_v4 = vpop.f32.mrb[10].mxu1  ;;  %5239 = vmatpush3.bf16.msra.mxu1 %v5683_v59  ;;  %5144 = vmatprep.subr.bf16.mxu0 %v5684_v60 }
 0x13a   :  { %v1518_v6 = vadd.f32 %v4855_v63, %v6682_v32  ;;  %v4879_v7 = vpop.f32.mrb[11].mxu1  ;;  %5240 = vmatprep.subr.bf16.mxu1 %v5733_v25 }
 0x13c   :  { %v1558_v10 = vadd.f32 %v4877_v3, %v1518_v6  ;;  %5145 = vmatpush3.bf16.msra.mxu0 %v5685_v5 }
 0x13d   :  { %5241 = vmatpush3.bf16.msra.mxu1 %v5686_v8  ;;  %5146 = vmatprep.subr.bf16.mxu0 %v5687_v9 }
 0x13e   :  { %5242 = vmatprep.subr.bf16.mxu1 %v5733_v25 }
 0x140   :  { %5147 = vmatpush3.bf16.msra.mxu0 %v5688_v11 }
 0x141   :  { %5243 = vmatpush3.bf16.msra.mxu1 %v5691_v12  ;;  %5248 = vmatprep.subr.bf16.mxu0 %v5733_v25 }
 0x142   :  { %5268 = vmatprep.subr.bf16.mxu1 %v5733_v25 }
 0x143   :  { %3370 = vmatmul.mubr.bf16.vlgmr.msra.gmra.mrb[36].mxu0 %v4497_v13 }
 0x144   :  { %5245 = vmatmul.mubr.bf16.vlgmr.msra.gmra.mrb[36].mxu1 %v5692_v14  ;;  %5264 = vmatprep.mubr.msk.bf16.mxu0 %vm5734_vm0, %v5733_v25 }
 0x145   :  { %5284 = vmatprep.mubr.msk.bf16.mxu1 %vm5734_vm0, %v5733_v25  ;;  %5249 = vmatpush3.bf16.msra.mxu0 %v5693_v50 }
 0x146   :  { %5250 = vmatprep.subr.bf16.mxu0 %v5733_v25 }
 0x149   :  { %5251 = vmatpush3.bf16.msra.mxu0 %v5694_v51 }
 0x14a   :  { %5252 = vmatprep.subr.bf16.mxu0 %v5733_v25 }
 0x14d   :  { %5253 = vmatpush3.bf16.msra.mxu0 %v5695_v52 }
 0x14e   :  { %5254 = vmatprep.subr.bf16.mxu0 %v5733_v25 }
 0x151   :  { %5255 = vmatpush3.bf16.msra.mxu0 %v5696_v53 }
 0x152   :  { %5256 = vmatprep.subr.bf16.mxu0 %v5733_v25 }
 0x155   :  { %5257 = vmatpush3.bf16.msra.mxu0 %v5697_v54 }
 0x156   :  { %v4897_v15 = vpop.f32.mrb[12].mxu0  ;;  %5258 = vmatprep.subr.bf16.mxu0 %v5733_v25 }
 0x157   :  { %v4898_v16 = vpop.f32.mrb[13].mxu0  ;;  %v4919_v17 = vpop.f32.mrb[12].mxu1 }
 0x158   :  { %v4899_v18 = vadd.f32 %v4898_v16, %v4897_v15  ;;  %v4900_v19 = vpop.f32.mrb[14].mxu0  ;;  %v4920_v20 = vpop.f32.mrb[13].mxu1 }
 0x159   :  { %v4901_v21 = vpop.f32.mrb[15].mxu0  ;;  %v4921_v22 = vadd.f32 %v4920_v20, %v4919_v17  ;;  %v4922_v23 = vpop.f32.mrb[14].mxu1  ;;  %5259 = vmatpush3.bf16.msra.mxu0 %v5698_v55  ;;  %v5707_v55 = vld [vmem:[%s6976_s4 + $0x70] sm:$0xff]  }
 0x15a   :  { %v1598_v24 = vadd.f32 %v4899_v18, %v1558_v10  ;;  %v4923_v26 = vpop.f32.mrb[15].mxu1  ;;  %5260 = vmatprep.subr.bf16.mxu0 %v5733_v25 }
 0x15c   :  { %v1638_v27 = vadd.f32 %v4921_v22, %v1598_v24 }
 0x176   :  { %v4941_v28 = vpop.f32.mrb[16].mxu0 }
 0x177   :  { %v4942_v29 = vpop.f32.mrb[17].mxu0  ;;  %v1717_v30 = vpop.f32.mrb[16].mxu1 }
 0x178   :  { %v4943_v31 = vadd.f32 %v4942_v29, %v4941_v28  ;;  %v4944_v32 = vpop.f32.mrb[18].mxu0  ;;  %v5226_v33 = vpop.f32.mrb[17].mxu1  ;;  %v5699_v29 = vld [vmem:[%s6976_s4 + $0x30] sm:$0xff]  }
 0x179   :  { %v4945_v34 = vpop.f32.mrb[19].mxu0  ;;  %v1720_v35 = vpop.f32.mrb[18].mxu1  ;;  %5261 = vmatpush3.bf16.msra.mxu0 %v5699_v29  ;;  %v5729_v29 = vld [vmem:[%s6979_s6 + $0x60] sm:$0xff]  }
 0x17a   :  { %v1678_v36 = vadd.f32 %v4943_v31, %v1638_v27  ;;  %v5227_v37 = vpop.f32.mrb[19].mxu1  ;;  %5262 = vmatprep.subr.bf16.mxu0 %v5733_v25 }
 0x17b   :  { %v5701_v37 = vld [vmem:[%s6976_s4 + $0x40] sm:$0xff]  }
 0x17c   :  { %v6785_v38 = vadd.f32 %v1717_v30, %v1678_v36  ;;  %v5700_v30 = vld [vmem:[%s6976_s4 + $0x38] sm:$0xff]   ;;  %5269 = vmatpush3.bf16.msra.mxu1 %v5701_v37 }
 0x17d   :  { %5263 = vmatpush3.bf16.msra.mxu0 %v5700_v30  ;;  %5270 = vmatprep.subr.bf16.mxu1 %v5733_v25  ;;  %v5730_v30 = vld [vmem:[%s6979_s6 + $0x68] sm:$0xff]  }
 0x17e   :  { %5288 = vmatprep.subr.bf16.mxu0 %v5733_v25 }
 0x196   :  { %v4972_v39 = vpop.f32.mrb[20].mxu0 }
 0x197   :  { %v4994_v40 = vpop.f32.mrb[20].mxu1  ;;  %v4973_v41 = vpop.f32.mrb[21].mxu0 }
 0x198   :  { %v4974_v42 = vadd.f32 %v4973_v41, %v4972_v39  ;;  %v4995_v43 = vpop.f32.mrb[21].mxu1  ;;  %v4975_v44 = vpop.f32.mrb[22].mxu0 }
 0x199   :  { %v4996_v45 = vadd.f32 %v4995_v43, %v4994_v40  ;;  %v4976_v46 = vpop.f32.mrb[23].mxu0  ;;  %v4997_v47 = vpop.f32.mrb[22].mxu1  ;;  %v5702_v43 = vld [vmem:[%s6976_s4 + $0x48] sm:$0xff]  }
 0x19a   :  { %v4998_v48 = vpop.f32.mrb[23].mxu1  ;;  %5271 = vmatpush3.bf16.msra.mxu1 %v5702_v43  ;;  %v5704_v46 = vld [vmem:[%s6976_s4 + $0x58] sm:$0xff]   ;;  %v5705_v47 = vld [vmem:[%s6976_s4 + $0x60] sm:$0xff]  }
 0x19b   :  { %v3092_v49 = vadd.f32 %v4996_v45, %v4974_v42  ;;  %v5703_v45 = vld [vmem:[%s6976_s4 + $0x50] sm:$0xff]   ;;  %5272 = vmatprep.subr.bf16.mxu1 %v5733_v25  ;;  %v5706_v48 = vld [vmem:[%s6976_s4 + $0x68] sm:$0xff]  }
 0x19e   :  { %5273 = vmatpush3.bf16.msra.mxu1 %v5703_v45 }
 0x19f   :  { %5274 = vmatprep.subr.bf16.mxu1 %v5733_v25 }
 0x1a2   :  { %5275 = vmatpush3.bf16.msra.mxu1 %v5704_v46 }
 0x1a3   :  { %5276 = vmatprep.subr.bf16.mxu1 %v5733_v25 }
 0x1a6   :  { %5277 = vmatpush3.bf16.msra.mxu1 %v5705_v47 }
 0x1a7   :  { %5278 = vmatprep.subr.bf16.mxu1 %v5733_v25 }
 0x1aa   :  { %5279 = vmatpush3.bf16.msra.mxu1 %v5706_v48 }
 0x1ab   :  { %5280 = vmatprep.subr.bf16.mxu1 %v5733_v25 }
 0x1ae   :  { %5281 = vmatpush3.bf16.msra.mxu1 %v5707_v55 }
 0x1af   :  { %5282 = vmatprep.subr.bf16.mxu1 %v5733_v25 }
 0x1b6   :  { %v5016_v56 = vpop.f32.mrb[24].mxu0 }
 0x1b7   :  { %v5017_v57 = vpop.f32.mrb[25].mxu0  ;;  %v5038_v58 = vpop.f32.mrb[24].mxu1 }
 0x1b8   :  { %v5018_v59 = vadd.f32 %v5017_v57, %v5016_v56  ;;  %v5019_v60 = vpop.f32.mrb[26].mxu0  ;;  %v5039_v61 = vpop.f32.mrb[25].mxu1  ;;  %v5708_v56 = vld [vmem:[%s6976_s4 + $0x78] sm:$0xff]   ;;  %v5710_v57 = vld [vmem:[%s6976_s4 + $0x88] sm:$0xff]  }
 0x1b9   :  { %v5020_v62 = vpop.f32.mrb[27].mxu0  ;;  %v5040_v63 = vadd.f32 %v5039_v61, %v5038_v58  ;;  %v5041_v0 = vpop.f32.mrb[26].mxu1  ;;  %5283 = vmatpush3.bf16.msra.mxu1 %v5708_v56  ;;  %v5711_v58 = vld [vmem:[%s6976_s4 + $0x90] sm:$0xff]   ;;  %v5713_v60 = vld [vmem:[%s6976_s4 + $0xa0] sm:$0xff]   ;;  %v5714_v61 = vld [vmem:[%s6976_s4 + $0xa8] sm:$0xff]  }
 0x1ba   :  { %v3132_v1 = vadd.f32 %v5018_v59, %v3092_v49  ;;  %v5042_v2 = vpop.f32.mrb[27].mxu1  ;;  %v4652_v49 = vld [vmem:[%s6977_s3] ss:$0 sm:$0xff]  ;;  %5308 = vmatprep.subr.bf16.mxu1 %v5733_v25  ;;  %v5712_v59 = vld [vmem:[%s6976_s4 + $0x98] sm:$0xff]  }
 0x1bb   :  { %v4653_v62 = vld [vmem:[%s6978_s5] ss:$0 sm:$0xff] }
 0x1bc   :  { %v3172_v3 = vadd.f32 %v5040_v63, %v3132_v1 }
 0x1d6   :  { %v5060_v4 = vpop.f32.mrb[28].mxu0 }
 0x1d7   :  { %v5061_v5 = vpop.f32.mrb[29].mxu0  ;;  %v5082_v6 = vpop.f32.mrb[28].mxu1 }
 0x1d8   :  { %v5062_v7 = vadd.f32 %v5061_v5, %v5060_v4  ;;  %v5063_v8 = vpop.f32.mrb[30].mxu0  ;;  %v5083_v9 = vpop.f32.mrb[29].mxu1 }
 0x1d9   :  { %v5064_v10 = vpop.f32.mrb[31].mxu0  ;;  %v5084_v11 = vadd.f32 %v5083_v9, %v5082_v6  ;;  %v5085_v12 = vpop.f32.mrb[30].mxu1  ;;  %v5715_v6 = vld [vmem:[%s6976_s4 + $0xb0] sm:$0xff]   ;;  %v5717_v8 = vld [vmem:[%s6979_s6] sm:$0xff]   ;;  %v5718_v9 = vld [vmem:[%s6979_s6 + $0x8] sm:$0xff]  }
 0x1da   :  { %v3212_v13 = vadd.f32 %v5062_v7, %v3172_v3  ;;  %v5086_v14 = vpop.f32.mrb[31].mxu1  ;;  %v5716_v7 = vld [vmem:[%s6976_s4 + $0xb8] sm:$0xff]   ;;  %v5719_v10 = vld [vmem:[%s6979_s6 + $0x10] sm:$0xff]   ;;  %v5721_v12 = vld [vmem:[%s6979_s6 + $0x20] sm:$0xff]  }
 0x1db   :  { %v5723_v14 = vld [vmem:[%s6979_s6 + $0x30] sm:$0xff]  }
 0x1dc   :  { %v3252_v15 = vadd.f32 %v5084_v11, %v3212_v13  ;;  %v5720_v11 = vld [vmem:[%s6979_s6 + $0x18] sm:$0xff]   ;;  %v5722_v13 = vld [vmem:[%s6979_s6 + $0x28] sm:$0xff]  }
 0x1f6   :  { %v5104_v16 = vpop.f32.mrb[32].mxu0 }
 0x1f7   :  { %v5105_v17 = vpop.f32.mrb[33].mxu0  ;;  %v5126_v18 = vpop.f32.mrb[32].mxu1 }
 0x1f8   :  { %v5106_v19 = vadd.f32 %v5105_v17, %v5104_v16  ;;  %v5107_v20 = vpop.f32.mrb[34].mxu0  ;;  %v5127_v21 = vpop.f32.mrb[33].mxu1 }
 0x1f9   :  { %v5108_v22 = vpop.f32.mrb[35].mxu0  ;;  %v5128_v23 = vadd.f32 %v5127_v21, %v5126_v18  ;;  %v5129_v24 = vpop.f32.mrb[34].mxu1 }
 0x1fa   :  { %v3292_v26 = vadd.f32 %v5106_v19, %v3252_v15  ;;  %v5130_v27 = vpop.f32.mrb[35].mxu1  ;;  %v4679_v15 = vld [vmem:[%s6978_s5 + $0x1] ss:$0 sm:$0xff] }
 0x1fb   :  { %v5725_v24 = vld [vmem:[%s6979_s6 + $0x40] sm:$0xff]   ;;  %v5727_v27 = vld [vmem:[%s6979_s6 + $0x50] sm:$0xff]  }
 0x1fc   :  { %v3332_v28 = vadd.f32 %v5128_v23, %v3292_v26  ;;  %v5724_v23 = vld [vmem:[%s6979_s6 + $0x38] sm:$0xff]   ;;  %v5726_v26 = vld [vmem:[%s6979_s6 + $0x48] sm:$0xff]  }
 0x216   :  { %v5148_v31 = vpop.f32.mrb[36].mxu0 }
 0x217   :  { %v5149_v32 = vpop.f32.mrb[37].mxu0  ;;  %v3411_v33 = vpop.f32.mrb[36].mxu1 }
 0x218   :  { %v5150_v34 = vadd.f32 %v5149_v32, %v5148_v31  ;;  %v5151_v35 = vpop.f32.mrb[38].mxu0  ;;  %v5246_v36 = vpop.f32.mrb[37].mxu1  ;;  %v4705_v31 = vld [vmem:[%s6978_s5 + $0x2] ss:$0 sm:$0xff] }
 0x219   :  { %v5152_v39 = vpop.f32.mrb[39].mxu0  ;;  %v3414_v40 = vpop.f32.mrb[38].mxu1 }
 0x21a   :  { %v3372_v41 = vadd.f32 %v5150_v34, %v3332_v28  ;;  %v5247_v42 = vpop.f32.mrb[39].mxu1  ;;  %v5728_v28 = vld [vmem:[%s6979_s6 + $0x58] sm:$0xff]   ;;  %v5731_v39 = vld [vmem:[%s6979_s6 + $0x70] sm:$0xff]  }
 0x21b   :  { %v5732_v40 = vld [vmem:[%s6979_s6 + $0x78] sm:$0xff]  }
 0x21c   :  { %v3412_v44 = vadd.f32 %v3411_v33, %v3372_v41  ;;  %v4714_v41 = vld [vmem:[%s6980_s7] ss:$0 sm:$0xff] }
 0x21e   :  { %3418 = vrot.lane.b32.xlu0 %v3412_v44, %s5735_s18 }
 0x290   :  { %v3419_v50 = vpop.permute.xlu0 %3418 }
 0x291   :  { %v3422_v51 = vsel %vm3421_vm1, %v6785_v38, %v3419_v50  ;;  %v5709_v38 = vld [vmem:[%s6976_s4 + $0x80] sm:$0xff]  }
 0x292   :  { %v3430_v52 = vadd.f32 %v4652_v49, %v3422_v51 }
 0x294   :  { %v3431_v53 = vmax.f32 %v3430_v52, 0.0 }
 0x296   :  { %v3432_v54 = vpack.c.bf16 %v3431_v53, %v3431_v53 }
 0x298   :  { %5265 = vmatmul.mubr.bf16.vlgmr.msra.gmra.mrb[40].mxu0 %v3432_v54 }
 0x299   :  { %5304 = vmatprep.mubr.msk.bf16.mxu0 %vm5734_vm0, %v5733_v25  ;;  %5289 = vmatpush3.bf16.msra.mxu0 %v5709_v38 }
 0x29a   :  { %5290 = vmatprep.subr.bf16.mxu0 %v5733_v25 }
 0x29d   :  { %5291 = vmatpush3.bf16.msra.mxu0 %v5710_v57 }
 0x29e   :  { %5292 = vmatprep.subr.bf16.mxu0 %v5733_v25 }
 0x2a1   :  { %5293 = vmatpush3.bf16.msra.mxu0 %v5711_v58 }
 0x2a2   :  { %5294 = vmatprep.subr.bf16.mxu0 %v5733_v25 }
 0x2a5   :  { %5295 = vmatpush3.bf16.msra.mxu0 %v5712_v59 }
 0x2a6   :  { %5296 = vmatprep.subr.bf16.mxu0 %v5733_v25 }
 0x2a9   :  { %5297 = vmatpush3.bf16.msra.mxu0 %v5713_v60 }
 0x2aa   :  { %5298 = vmatprep.subr.bf16.mxu0 %v5733_v25 }
 0x2ad   :  { %5299 = vmatpush3.bf16.msra.mxu0 %v5714_v61 }
 0x2ae   :  { %5300 = vmatprep.subr.bf16.mxu0 %v5733_v25 }
 0x2b1   :  { %5301 = vmatpush3.bf16.msra.mxu0 %v5715_v6 }
 0x2b2   :  { %5302 = vmatprep.subr.bf16.mxu0 %v5733_v25 }
 0x2b5   :  { %5303 = vmatpush3.bf16.msra.mxu0 %v5716_v7 }
 0x2b6   :  { %5328 = vmatprep.subr.bf16.mxu0 %v5733_v25 }
 0x36b   :  { %v3538_v63 = vpop.f32.mrb[40].mxu0 }
 0x36c   :  { %v3539_v0 = vadd.f32 %v4653_v62, %v3538_v63  ;;  %v5266_v1 = vpop.f32.mrb[41].mxu0 }
 0x36d   :  { %v3541_v2 = vpop.f32.mrb[42].mxu0 }
 0x36e   :  { %v3544_v3 = vmax.f32 %v3539_v0, 0.0  ;;  %v5267_v4 = vpop.f32.mrb[43].mxu0 }
 0x370   :  { %v3545_v5 = vpack.c.bf16 %v3544_v3, %v3544_v3 }
 0x372   :  { %5285 = vmatmul.mubr.bf16.vlgmr.msra.gmra.mrb[40].mxu1 %v3545_v5 }
 0x373   :  { %5324 = vmatprep.mubr.msk.bf16.mxu1 %vm5734_vm0, %v5733_v25  ;;  %5309 = vmatpush3.bf16.msra.mxu1 %v5717_v8 }
 0x374   :  { %5310 = vmatprep.subr.bf16.mxu1 %v5733_v25 }
 0x377   :  { %5311 = vmatpush3.bf16.msra.mxu1 %v5718_v9 }
 0x378   :  { %5312 = vmatprep.subr.bf16.mxu1 %v5733_v25 }
 0x37b   :  { %5313 = vmatpush3.bf16.msra.mxu1 %v5719_v10 }
 0x37c   :  { %5314 = vmatprep.subr.bf16.mxu1 %v5733_v25 }
 0x37f   :  { %5315 = vmatpush3.bf16.msra.mxu1 %v5720_v11 }
 0x380   :  { %5316 = vmatprep.subr.bf16.mxu1 %v5733_v25 }
 0x383   :  { %5317 = vmatpush3.bf16.msra.mxu1 %v5721_v12 }
 0x384   :  { %5318 = vmatprep.subr.bf16.mxu1 %v5733_v25 }
 0x387   :  { %5319 = vmatpush3.bf16.msra.mxu1 %v5722_v13 }
 0x388   :  { %5320 = vmatprep.subr.bf16.mxu1 %v5733_v25 }
 0x38b   :  { %5321 = vmatpush3.bf16.msra.mxu1 %v5723_v14 }
 0x38c   :  { %5322 = vmatprep.subr.bf16.mxu1 %v5733_v25 }
 0x38f   :  { %5323 = vmatpush3.bf16.msra.mxu1 %v5724_v23 }
 0x445   :  { %v3653_v16 = vpop.f32.mrb[40].mxu1 }
 0x446   :  { %v3654_v17 = vadd.f32 %v4679_v15, %v3653_v16  ;;  %v5286_v18 = vpop.f32.mrb[41].mxu1 }
 0x447   :  { %v3656_v19 = vpop.f32.mrb[42].mxu1 }
 0x448   :  { %v3659_v20 = vmax.f32 %v3654_v17, 0.0  ;;  %v5287_v21 = vpop.f32.mrb[43].mxu1 }
 0x44a   :  { %v3660_v22 = vpack.c.bf16 %v3659_v20, %v3659_v20 }
 0x44c   :  { %5305 = vmatmul.mubr.bf16.vlgmr.msra.gmra.mrb[44].mxu0 %v3660_v22 }
 0x44d   :  { %5344 = vmatprep.mubr.msk.bf16.mxu0 %vm5734_vm0, %v5733_v25  ;;  %5329 = vmatpush3.bf16.msra.mxu0 %v5725_v24 }
 0x44e   :  { %5330 = vmatprep.subr.bf16.mxu0 %v5733_v25 }
 0x451   :  { %5331 = vmatpush3.bf16.msra.mxu0 %v5726_v26 }
 0x452   :  { %5332 = vmatprep.subr.bf16.mxu0 %v5733_v25 }
 0x455   :  { %5333 = vmatpush3.bf16.msra.mxu0 %v5727_v27 }
 0x456   :  { %5334 = vmatprep.subr.bf16.mxu0 %v5733_v25 }
 0x459   :  { %5335 = vmatpush3.bf16.msra.mxu0 %v5728_v28 }
 0x45a   :  { %5336 = vmatprep.subr.bf16.mxu0 %v5733_v25 }
 0x45d   :  { %5337 = vmatpush3.bf16.msra.mxu0 %v5729_v29 }
 0x45e   :  { %5338 = vmatprep.subr.bf16.mxu0 %v5733_v25 }
 0x461   :  { %5339 = vmatpush3.bf16.msra.mxu0 %v5730_v30 }
 0x462   :  { %5340 = vmatprep.subr.bf16.mxu0 %v5733_v25 }
 0x465   :  { %5341 = vmatpush3.bf16.msra.mxu0 %v5731_v39 }
 0x466   :  { %5342 = vmatprep.subr.bf16.mxu0 %v5733_v25  ;;  %v4740_v25 = vld [vmem:[%s6980_s7 + $0x1] ss:$0 sm:$0xff] }
 0x469   :  { %5343 = vmatpush3.bf16.msra.mxu0 %v5732_v40 }
 0x51f   :  { %v3768_v32 = vpop.f32.mrb[44].mxu0 }
 0x520   :  { %v3769_v33 = vadd.f32 %v4705_v31, %v3768_v32  ;;  %v5306_v34 = vpop.f32.mrb[45].mxu0 }
 0x521   :  { %v3771_v35 = vpop.f32.mrb[46].mxu0 }
 0x522   :  { %v3774_v36 = vpack.c.bf16 %v3769_v33, %v3769_v33  ;;  %v5307_v37 = vpop.f32.mrb[47].mxu0 }
 0x524   :  { %5325 = vmatmul.mubr.bf16.vlgmr.msra.gmra.mrb[44].mxu1 %v3774_v36 }
 0x5f7   :  { %v3880_v42 = vpop.f32.mrb[44].mxu1 }
 0x5f8   :  { %v3881_v43 = vadd.f32 %v4714_v41, %v3880_v42  ;;  %v5326_v44 = vpop.f32.mrb[45].mxu1 }
 0x5f9   :  { %v3883_v45 = vpop.f32.mrb[46].mxu1 }
 0x5fa   :  { %v3886_v46 = vmax.f32 %v3881_v43, 0.0  ;;  %v5327_v47 = vpop.f32.mrb[47].mxu1 }
 0x5fc   :  { %v3887_v48 = vpack.c.bf16 %v3886_v46, %v3886_v46 }
 0x5fe   :  { %5345 = vmatmul.mubr.bf16.vlgmr.msra.gmra.mrb[48].mxu0 %v3887_v48 }
 0x6d1   :  { %v3995_v49 = vpop.f32.mrb[48].mxu0 }
 0x6d2   :  { %v3996_v50 = vadd.f32 %v4740_v25, %v3995_v49  ;;  %v5346_v51 = vpop.f32.mrb[49].mxu0 }
 0x6d3   :  { %v3998_v52 = vpop.f32.mrb[50].mxu0 }
 0x6d4   :  { %4001 = vst [vmem:[%s6981_s8] sm:$0xff] %v3996_v50  ;;  %v5347_v53 = vpop.f32.mrb[51].mxu0 }

</bundles_post_ra>
